<compile_context>
chip_gen: v7x
topology: tpu7x:2x2x1
jax: 0.10.0
libtpu: 0.0.40
codegen_flags: <defaults>
</compile_context>

<pallas_src>
import functools

import jax
import jax.numpy as jnp
from jax import lax
from jax.experimental import pallas as pl
from jax.experimental.pallas import tpu as pltpu


def _round_up(x, m):
    return ((x + m - 1) // m) * m


def _rel_ffn_kernel(hidx_ref, tidx_ref, span_ref,
                    w1h_ref, w1t_ref, b1_ref, w2_ref, b2_ref,
                    o_ref, h_sc, t_sc, *acc_scratch,
                    onehot_gather, acc_in_out):
    """Grid = (row_tiles, f_tiles); f is the innermost (reduction) axis.

    onehot_gather=True : hidx/tidx are (TM, 1) int32 VMEM blocks.
    onehot_gather=False: hidx/tidx are full (N_pad,) int32 SMEM refs (scalar prefetch).
    span_ref           : (BS_pad, H_pad) bf16, fully resident (single-buffered).
    w1h/w1t            : (H_pad, TF) bf16 (W1 split for the fused concat).
    w2                 : (TF, H_pad) bf16.  b1: (1, TF) f32.  b2: (1, H_pad) f32.
    o_ref              : (TM, H_pad); used directly as the f32 accumulator when
                         acc_in_out=True, otherwise acc_scratch[0] (f32) is used.
    h_sc / t_sc        : (TM, H_pad) bf16 gathered rows, cached across F slabs.
    """
    f = pl.program_id(1)
    nf = pl.num_programs(1)
    tm = h_sc.shape[0]
    acc_ref = o_ref if acc_in_out else acc_scratch[0]

    @pl.when(f == 0)
    def _gather_and_init():
        if onehot_gather:
            # Fused gather on the MXU: one (2*TM, BS) one-hot @ span table.
            bs = span_ref.shape[0]
            idx = jnp.concatenate([hidx_ref[...], tidx_ref[...]], axis=0)   # (2TM, 1)
            col = lax.broadcasted_iota(jnp.int32, (2 * tm, bs), 1)
            oh = (col == idx).astype(span_ref.dtype)                         # (2TM, BS)
            ht = jnp.dot(oh, span_ref[...], preferred_element_type=jnp.float32)
            h_sc[...] = ht[:tm].astype(h_sc.dtype)
            t_sc[...] = ht[tm:].astype(t_sc.dtype)
        else:
            # Scalar-indexed row copies (indices live in SMEM); better than the
            # one-hot matmul when the span table is much larger than the FFN dim.
            base = pl.program_id(0) * tm

            def body(r, carry):
                h_sc[r, :] = span_ref[hidx_ref[base + r], :]
                t_sc[r, :] = span_ref[tidx_ref[base + r], :]
                return carry

            lax.fori_loop(0, tm, body, 0, unroll=False)
        acc_ref[...] = jnp.zeros_like(acc_ref)

    # concat([h, t], -1) @ W1  ==  h @ W1[:H] + t @ W1[H:]     (per F slab)
    z = (jnp.dot(h_sc[...], w1h_ref[...], preferred_element_type=jnp.float32)
         + jnp.dot(t_sc[...], w1t_ref[...], preferred_element_type=jnp.float32)
         + b1_ref[...])
    a = jnp.maximum(z, 0.0).astype(w2_ref.dtype)   # ReLU; dropout == identity (eval)
    acc_ref[...] += jnp.dot(a, w2_ref[...],
                            preferred_element_type=jnp.float32).astype(acc_ref.dtype)

    @pl.when(f == nf - 1)
    def _finalize():
        o_ref[...] = (acc_ref[...].astype(jnp.float32) + b2_ref[...]).astype(o_ref.dtype)


def rel_rep_no_context(span_reps, rel_ids, params, *, row_tile=512):
    """Forward pass of RelRepNoContext.

    span_reps : (B, S, H) float32
    rel_ids   : (B, R, 2) int32, entries in [0, S)
    params    : dict with w1 (2H, F), b1 (F,), w2 (F, H), b2 (H,)
    returns   : (B, R, H) in span_reps.dtype
    """
    B, S, H = span_reps.shape
    _, R, _ = rel_ids.shape
    w1, b1, w2, b2 = params["w1"], params["b1"], params["w2"], params["b2"]
    F = w1.shape[1]
    out_dtype = span_reps.dtype
    out_bytes = jnp.dtype(out_dtype).itemsize

    # --- padded, lane-dense sizes ---
    H_pad = _round_up(H, 128)
    F_full = _round_up(F, 128)
    BS = B * S
    BS_pad = _round_up(BS, 128)
    N = B * R

    # One-hot MXU gather is cheap while the span table is small relative to F;
    # switch to a scalar-indexed row-copy gather once B*S dominates.
    use_onehot = BS_pad <= max(512, (3 * F_full) // 2)

    # --- per-generation VMEM budget (v7x ~64 MiB/TC, v6e/v5e 128 MiB) ---
    try:
        phys = int(getattr(pltpu.get_tpu_info(), "vmem_capacity_bytes", 0) or 0)
    except Exception:
        phys = 0
    if phys <= 0:
        phys = 64 * 1024 * 1024                       # conservative: v7x per-TC VMEM
    vmem_limit = max(32 * 1024 * 1024, min(int(phys * 0.85), 112 * 1024 * 1024))
    budget = int(vmem_limit * 0.8)                    # headroom for compiler scratch

    # --- tile selection: prefer fully-resident weights (TF == F_full) ---
    gran = 256 if _round_up(N, 128) >= 256 else 128   # MXU-aligned row tiles
    tm0 = min(_round_up(row_tile, gran), _round_up(N, gran))

    def est(tm, tf, resident):
        span_b = BS_pad * H_pad * 2                              # bf16, single-buffered
        wfac = 1 if resident else 2                              # streamed slabs double-buffer
        w_b = wfac * (3 * H_pad * tf * 2 + tf * 4) + 2 * H_pad * 4
        idx_b = (4 * tm * 128 * 4) if use_onehot else 4096       # (TM,1) blocks pad to 128 lanes
        out_b = 2 * tm * H_pad * out_bytes
        scr_b = 2 * tm * H_pad * 2 + (0 if resident else tm * H_pad * 4)
        trans_b = tm * tf * 6                                    # z (f32) + relu (bf16)
        if use_onehot:
            trans_b += 2 * tm * (BS_pad * 2 + H_pad * 4)         # one-hot + gathered rows
        return span_b + w_b + idx_b + out_b + scr_b + trans_b

    tf_cands = [F_full] + [t for t in (2048, 1024, 512, 256, 128) if t < F_full]
    TM = TF = None
    tm_try = tm0
    while TM is None:
        for tf in tf_cands:
            if est(tm_try, tf, tf == F_full) <= budget:
                TM, TF = tm_try, tf
                break
        if TM is None:
            if tm_try <= 128:
                # Best effort; may still exceed VMEM for huge span tables.
                # TODO(synk): HBM-resident span table + per-row DMA gather fallback.
                TM, TF = 128, 128
            else:
                tm_try = max(128, tm_try // 2)

    F_pad = _round_up(F, TF)
    nf = F_pad // TF
    resident = nf == 1
    N_pad = _round_up(N, TM)
    acc_in_out = (out_dtype == jnp.float32)           # accumulate directly into o_ref
    need_acc = not acc_in_out

    # --- span table (bf16, zero padded) + flat head/tail row indices ---
    span_flat = jnp.zeros((BS_pad, H_pad), jnp.bfloat16)
    span_flat = span_flat.at[:BS, :H].set(span_reps.reshape(BS, H).astype(jnp.bfloat16))

    ids = jnp.clip(rel_ids.astype(jnp.int32), 0, S - 1)   # guard padding sentinels
    batch_off = (jnp.arange(B, dtype=jnp.int32) * S)[:, None]
    head_idx = jnp.zeros((N_pad,), jnp.int32).at[:N].set((ids[..., 0] + batch_off).reshape(N))
    tail_idx = jnp.zeros((N_pad,), jnp.int32).at[:N].set((ids[..., 1] + batch_off).reshape(N))

    # --- bf16 weights, zero-padded to lane-aligned shapes ---
    def pad2(x, r, c):
        return jnp.zeros((r, c), x.dtype).at[:x.shape[0], :x.shape[1]].set(x)

    w1h = pad2(w1[:H, :].astype(jnp.bfloat16), H_pad, F_pad)
    w1t = pad2(w1[H:, :].astype(jnp.bfloat16), H_pad, F_pad)
    w2p = pad2(w2.astype(jnp.bfloat16), F_pad, H_pad)
    b1p = pad2(b1.reshape(1, F).astype(jnp.float32), 1, F_pad)
    b2p = pad2(b2.reshape(1, H).astype(jnp.float32), 1, H_pad)

    grid = (N_pad // TM, nf)

    def spec(shape, index_map, single=False):
        if single:
            try:
                return pl.BlockSpec(shape, index_map, pipeline_mode=pl.Buffered(1))
            except Exception:   # pipeline_mode / Buffered unavailable -> default buffering
                pass
        return pl.BlockSpec(shape, index_map)

    def build_and_run(allow_single_buffer):
        sb = allow_single_buffer
        w_single = sb and resident
        span_spec = spec((BS_pad, H_pad), lambda i, f, *_: (0, 0), single=sb)
        w1h_spec = spec((H_pad, TF), lambda i, f, *_: (0, f), single=w_single)
        w1t_spec = spec((H_pad, TF), lambda i, f, *_: (0, f), single=w_single)
        b1_spec = spec((1, TF), lambda i, f, *_: (0, f), single=w_single)
        w2_spec = spec((TF, H_pad), lambda i, f, *_: (f, 0), single=w_single)
        b2_spec = spec((1, H_pad), lambda i, f, *_: (0, 0), single=sb)
        out_spec = pl.BlockSpec((TM, H_pad), lambda i, f, *_: (i, 0))

        scratch = [pltpu.VMEM((TM, H_pad), jnp.bfloat16),    # gathered head rows
                   pltpu.VMEM((TM, H_pad), jnp.bfloat16)]    # gathered tail rows
        if need_acc:
            scratch.append(pltpu.VMEM((TM, H_pad), jnp.float32))

        kern = functools.partial(_rel_ffn_kernel,
                                 onehot_gather=use_onehot,
                                 acc_in_out=acc_in_out)

        if use_onehot:
            num_prefetch = 0
            in_specs = [spec((TM, 1), lambda i, f, *_: (i, 0)),
                        spec((TM, 1), lambda i, f, *_: (i, 0)),
                        span_spec, w1h_spec, w1t_spec, b1_spec, w2_spec, b2_spec]
            args = (head_idx.reshape(N_pad, 1), tail_idx.reshape(N_pad, 1),
                    span_flat, w1h, w1t, b1p, w2p, b2p)
        else:
            num_prefetch = 2   # head/tail indices live in SMEM
            in_specs = [span_spec, w1h_spec, w1t_spec, b1_spec, w2_spec, b2_spec]
            args = (head_idx, tail_idx, span_flat, w1h, w1t, b1p, w2p, b2p)

        return pl.pallas_call(
            kern,
            out_shape=jax.ShapeDtypeStruct((N_pad, H_pad), out_dtype),
            grid_spec=pltpu.PrefetchScalarGridSpec(
                num_scalar_prefetch=num_prefetch,
                grid=grid,
                in_specs=in_specs,
                out_specs=out_spec,
                scratch_shapes=scratch),
            compiler_params=pltpu.CompilerParams(
                dimension_semantics=("parallel", "arbitrary"),
                vmem_limit_bytes=vmem_limit),
        )(*args)

    try:
        out = build_and_run(True)
    except Exception:
        out = build_and_run(False)   # fall back to default double-buffering everywhere

    return out[:N, :H].reshape(B, R, H)


def init_params(key, hidden_size, ffn_ratio):
    """Deterministic parameter init mirroring nn.Linear shapes of ProjectionLayer."""
    in_dim = 2 * hidden_size
    ffn_dim = int(hidden_size * ffn_ratio)
    k1, k2, k3, k4 = jax.random.split(key, 4)
    lim1 = (1.0 / in_dim) ** 0.5
    lim2 = (1.0 / ffn_dim) ** 0.5
    return {
        "w1": jax.random.uniform(k1, (in_dim, ffn_dim), jnp.float32, -lim1, lim1),
        "b1": jax.random.uniform(k2, (ffn_dim,), jnp.float32, -lim1, lim1),
        "w2": jax.random.uniform(k3, (ffn_dim, hidden_size), jnp.float32, -lim2, lim2),
        "b2": jax.random.uniform(k4, (hidden_size,), jnp.float32, -lim2, lim2),
    }


def _reference(span_reps, rel_ids, params):
    """Pure-JAX reference using the same bf16-rounded operands the MXU consumes."""
    def q(x):
        return x.astype(jnp.bfloat16).astype(jnp.float32)

    head = jnp.take_along_axis(q(span_reps), rel_ids[..., 0:1], axis=1)
    tail = jnp.take_along_axis(q(span_reps), rel_ids[..., 1:2], axis=1)
    x = jnp.concatenate([head, tail], axis=-1)
    z = jnp.maximum(x @ q(params["w1"]) + params["b1"], 0.0)
    return q(z) @ q(params["w2"]) + params["b2"]


if __name__ == "__main__":
    # Small deterministic example shapes
    B, S, H, R = 2, 8, 32, 8          # batch, num_spans, hidden, num_relations
    FFN_RATIO = 4.0

    key = jax.random.PRNGKey(0)
    k_span, k_rel, k_param = jax.random.split(key, 3)

    span_reps = jax.random.normal(k_span, (B, S, H), dtype=jnp.float32)
    rel_ids = jax.random.randint(k_rel, (B, R, 2), 0, S, dtype=jnp.int32)
    params = init_params(k_param, H, FFN_RATIO)

    out = rel_rep_no_context(span_reps, rel_ids, params)
    out = jax.block_until_ready(out)

    ref = _reference(span_reps, rel_ids, params)
    assert out.shape == (B, R, H), out.shape
    assert jnp.allclose(out, ref, atol=1e-2, rtol=1e-2), "mismatch vs reference"

    print("KERNEL_OK")
</pallas_src>

<mosaic_0001>
module attributes {stable_mosaic.version = 11 : i64} {
  func.func @_rel_ffn_kernel(%arg0: i32, %arg1: i32, %arg2: memref<128x1xi32, #tpu.memory_space<vmem>>, %arg3: memref<128x1xi32, #tpu.memory_space<vmem>>, %arg4: memref<128x128xbf16, #tpu.memory_space<vmem>>, %arg5: memref<128x128xbf16, #tpu.memory_space<vmem>>, %arg6: memref<128x128xbf16, #tpu.memory_space<vmem>>, %arg7: memref<1x128xf32, #tpu.memory_space<vmem>>, %arg8: memref<128x128xbf16, #tpu.memory_space<vmem>>, %arg9: memref<1x128xf32, #tpu.memory_space<vmem>>, %arg10: memref<128x128xf32, #tpu.memory_space<vmem>>, %arg11: memref<128x128xbf16, #tpu.memory_space<vmem>>, %arg12: memref<128x128xbf16, #tpu.memory_space<vmem>>) attributes {dimension_semantics = [#tpu.dimension_semantics<parallel>, #tpu.dimension_semantics<arbitrary>], iteration_bounds = array<i64: 1, 1>, scalar_prefetch = 0 : i64, scratch_operands = 2 : i64, tpu.core_type = #tpu.core_type<tc>, window_params = [{transform_indices = @transform_0, window_bounds = array<i64: 128, 1>}, {transform_indices = @transform_1, window_bounds = array<i64: 128, 1>}, {pipeline_mode = #tpu.pipeline_mode<synchronous>, transform_indices = @transform_2, window_bounds = array<i64: 128, 128>}, {pipeline_mode = #tpu.pipeline_mode<synchronous>, transform_indices = @transform_3, window_bounds = array<i64: 128, 128>}, {pipeline_mode = #tpu.pipeline_mode<synchronous>, transform_indices = @transform_4, window_bounds = array<i64: 128, 128>}, {pipeline_mode = #tpu.pipeline_mode<synchronous>, transform_indices = @transform_5, window_bounds = array<i64: 1, 128>}, {pipeline_mode = #tpu.pipeline_mode<synchronous>, transform_indices = @transform_6, window_bounds = array<i64: 128, 128>}, {pipeline_mode = #tpu.pipeline_mode<synchronous>, transform_indices = @transform_7, window_bounds = array<i64: 1, 128>}, {transform_indices = @transform_8, window_bounds = array<i64: 128, 128>}]} {
    %c0_i32 = arith.constant 0 : i32
    %0 = arith.cmpi eq, %arg1, %c0_i32 : i32
    %1 = arith.extui %0 : i1 to i32
    %c0_i32_0 = arith.constant 0 : i32
    %2 = arith.cmpi ne, %1, %c0_i32_0 : i32
    scf.if %2 {
      %c0_21 = arith.constant 0 : index
      %c0_22 = arith.constant 0 : index
      %24 = vector.load %arg2[%c0_21, %c0_22] : memref<128x1xi32, #tpu.memory_space<vmem>>, vector<128x1xi32>
      %c0_23 = arith.constant 0 : index
      %c0_24 = arith.constant 0 : index
      %25 = vector.load %arg3[%c0_23, %c0_24] : memref<128x1xi32, #tpu.memory_space<vmem>>, vector<128x1xi32>
      %26 = tpu.concatenate %24, %25 in 0 : vector<128x1xi32>, vector<128x1xi32> -> vector<256x1xi32>
      %27 = tpu.iota {dimensions = array<i32: 1>} : vector<256x128xi32>
      %28 = vector.broadcast %26 : vector<256x1xi32> to vector<256x128xi32>
      %29 = arith.cmpi eq, %27, %28 : vector<256x128xi32>
      %30 = arith.extui %29 : vector<256x128xi1> to vector<256x128xi32>
      %31 = arith.sitofp %30 : vector<256x128xi32> to vector<256x128xf32>
      %32 = arith.truncf %31 : vector<256x128xf32> to vector<256x128xbf16>
      %c0_25 = arith.constant 0 : index
      %c0_26 = arith.constant 0 : index
      %33 = vector.load %arg4[%c0_25, %c0_26] : memref<128x128xbf16, #tpu.memory_space<vmem>>, vector<128x128xbf16>
      %cst_27 = arith.constant dense<0.000000e+00> : vector<256x128xf32>
      %34 = tpu.matmul %32, %33, %cst_27 {dimension_numbers = #tpu.dot_dimension_numbers<[1], [0], [0], [1], [0, 0, 1, 1], [], []>} : vector<256x128xbf16>, vector<128x128xbf16>, vector<256x128xf32> -> vector<256x128xf32>
      %35 = vector.extract_strided_slice %34 {offsets = [0, 0], sizes = [128, 128], strides = [1, 1]} : vector<256x128xf32> to vector<128x128xf32>
      %36 = arith.truncf %35 : vector<128x128xf32> to vector<128x128xbf16>
      %c0_28 = arith.constant 0 : index
      %c0_29 = arith.constant 0 : index
      %37 = vector.load %arg11[%c0_28, %c0_29] : memref<128x128xbf16, #tpu.memory_space<vmem>>, vector<128x128xbf16>
      tpu.vector_store %arg11[%c0_28, %c0_29], %36 {strides = array<i32>} : memref<128x128xbf16, #tpu.memory_space<vmem>>, vector<128x128xbf16>,
      %38 = vector.extract_strided_slice %34 {offsets = [128, 0], sizes = [128, 128], strides = [1, 1]} : vector<256x128xf32> to vector<128x128xf32>
      %39 = arith.truncf %38 : vector<128x128xf32> to vector<128x128xbf16>
      %c0_30 = arith.constant 0 : index
      %c0_31 = arith.constant 0 : index
      %40 = vector.load %arg12[%c0_30, %c0_31] : memref<128x128xbf16, #tpu.memory_space<vmem>>, vector<128x128xbf16>
      tpu.vector_store %arg12[%c0_30, %c0_31], %39 {strides = array<i32>} : memref<128x128xbf16, #tpu.memory_space<vmem>>, vector<128x128xbf16>,
      %cst_32 = arith.constant 0.000000e+00 : f32
      %41 = vector.broadcast %cst_32 : f32 to vector<128x128xf32>
      %c0_33 = arith.constant 0 : index
      %c0_34 = arith.constant 0 : index
      %42 = vector.load %arg10[%c0_33, %c0_34] : memref<128x128xf32, #tpu.memory_space<vmem>>, vector<128x128xf32>
      tpu.vector_store %arg10[%c0_33, %c0_34], %41 {strides = array<i32>} : memref<128x128xf32, #tpu.memory_space<vmem>>, vector<128x128xf32>,
    } else {
    }
    %c0 = arith.constant 0 : index
    %c0_1 = arith.constant 0 : index
    %3 = vector.load %arg11[%c0, %c0_1] : memref<128x128xbf16, #tpu.memory_space<vmem>>, vector<128x128xbf16>
    %c0_2 = arith.constant 0 : index
    %c0_3 = arith.constant 0 : index
    %4 = vector.load %arg5[%c0_2, %c0_3] : memref<128x128xbf16, #tpu.memory_space<vmem>>, vector<128x128xbf16>
    %cst = arith.constant dense<0.000000e+00> : vector<128x128xf32>
    %5 = tpu.matmul %3, %4, %cst {dimension_numbers = #tpu.dot_dimension_numbers<[1], [0], [0], [1], [0, 0, 1, 1], [], []>} : vector<128x128xbf16>, vector<128x128xbf16>, vector<128x128xf32> -> vector<128x128xf32>
    %c0_4 = arith.constant 0 : index
    %c0_5 = arith.constant 0 : index
    %6 = vector.load %arg12[%c0_4, %c0_5] : memref<128x128xbf16, #tpu.memory_space<vmem>>, vector<128x128xbf16>
    %c0_6 = arith.constant 0 : index
    %c0_7 = arith.constant 0 : index
    %7 = vector.load %arg6[%c0_6, %c0_7] : memref<128x128xbf16, #tpu.memory_space<vmem>>, vector<128x128xbf16>
    %cst_8 = arith.constant dense<0.000000e+00> : vector<128x128xf32>
    %8 = tpu.matmul %6, %7, %cst_8 {dimension_numbers = #tpu.dot_dimension_numbers<[1], [0], [0], [1], [0, 0, 1, 1], [], []>} : vector<128x128xbf16>, vector<128x128xbf16>, vector<128x128xf32> -> vector<128x128xf32>
    %9 = arith.addf %5, %8 : vector<128x128xf32>
    %c0_9 = arith.constant 0 : index
    %c0_10 = arith.constant 0 : index
    %10 = vector.load %arg7[%c0_9, %c0_10] : memref<1x128xf32, #tpu.memory_space<vmem>>, vector<1x128xf32>
    %11 = vector.broadcast %10 : vector<1x128xf32> to vector<128x128xf32>
    %12 = arith.addf %9, %11 : vector<128x128xf32>
    %cst_11 = arith.constant 0.000000e+00 : f32
    %13 = vector.broadcast %cst_11 : f32 to vector<128x128xf32>
    %14 = arith.maximumf %12, %13 : vector<128x128xf32>
    %15 = arith.truncf %14 : vector<128x128xf32> to vector<128x128xbf16>
    %c0_12 = arith.constant 0 : index
    %c0_13 = arith.constant 0 : index
    %16 = vector.load %arg10[%c0_12, %c0_13] : memref<128x128xf32, #tpu.memory_space<vmem>>, vector<128x128xf32>
    %c0_14 = arith.constant 0 : index
    %c0_15 = arith.constant 0 : index
    %17 = vector.load %arg8[%c0_14, %c0_15] : memref<128x128xbf16, #tpu.memory_space<vmem>>, vector<128x128xbf16>
    %cst_16 = arith.constant dense<0.000000e+00> : vector<128x128xf32>
    %18 = tpu.matmul %15, %17, %cst_16 {dimension_numbers = #tpu.dot_dimension_numbers<[1], [0], [0], [1], [0, 0, 1, 1], [], []>} : vector<128x128xbf16>, vector<128x128xbf16>, vector<128x128xf32> -> vector<128x128xf32>
    %19 = arith.addf %16, %18 : vector<128x128xf32>
    %c0_17 = arith.constant 0 : index
    %c0_18 = arith.constant 0 : index
    %20 = vector.load %arg10[%c0_17, %c0_18] : memref<128x128xf32, #tpu.memory_space<vmem>>, vector<128x128xf32>
    tpu.vector_store %arg10[%c0_17, %c0_18], %19 {strides = array<i32>} : memref<128x128xf32, #tpu.memory_space<vmem>>, vector<128x128xf32>,
    %c0_i32_19 = arith.constant 0 : i32
    %21 = arith.cmpi eq, %arg1, %c0_i32_19 : i32
    %22 = arith.extui %21 : i1 to i32
    %c0_i32_20 = arith.constant 0 : i32
    %23 = arith.cmpi ne, %22, %c0_i32_20 : i32
    scf.if %23 {
      %c0_21 = arith.constant 0 : index
      %c0_22 = arith.constant 0 : index
      %24 = vector.load %arg10[%c0_21, %c0_22] : memref<128x128xf32, #tpu.memory_space<vmem>>, vector<128x128xf32>
      %c0_23 = arith.constant 0 : index
      %c0_24 = arith.constant 0 : index
      %25 = vector.load %arg9[%c0_23, %c0_24] : memref<1x128xf32, #tpu.memory_space<vmem>>, vector<1x128xf32>
      %26 = vector.broadcast %25 : vector<1x128xf32> to vector<128x128xf32>
      %27 = arith.addf %24, %26 : vector<128x128xf32>
      %c0_25 = arith.constant 0 : index
      %c0_26 = arith.constant 0 : index
      %28 = vector.load %arg10[%c0_25, %c0_26] : memref<128x128xf32, #tpu.memory_space<vmem>>, vector<128x128xf32>
      tpu.vector_store %arg10[%c0_25, %c0_26], %27 {strides = array<i32>} : memref<128x128xf32, #tpu.memory_space<vmem>>, vector<128x128xf32>,
    } else {
    }
    return
  }
  func.func @transform_0(%arg0: i32, %arg1: i32) -> (i32, i32) {
    %c0_i32 = arith.constant 0 : i32
    %c0_i32_0 = arith.constant 0 : i32
    return %arg0, %c0_i32 : i32, i32
  }
  func.func @transform_1(%arg0: i32, %arg1: i32) -> (i32, i32) {
    %c0_i32 = arith.constant 0 : i32
    %c0_i32_0 = arith.constant 0 : i32
    return %arg0, %c0_i32 : i32, i32
  }
  func.func @transform_2(%arg0: i32, %arg1: i32) -> (i32, i32) {
    %c0_i32 = arith.constant 0 : i32
    %c0_i32_0 = arith.constant 0 : i32
    %c0_i32_1 = arith.constant 0 : i32
    return %c0_i32, %c0_i32_0 : i32, i32
  }
  func.func @transform_3(%arg0: i32, %arg1: i32) -> (i32, i32) {
    %c0_i32 = arith.constant 0 : i32
    %c0_i32_0 = arith.constant 0 : i32
    return %c0_i32, %arg1 : i32, i32
  }
  func.func @transform_4(%arg0: i32, %arg1: i32) -> (i32, i32) {
    %c0_i32 = arith.constant 0 : i32
    %c0_i32_0 = arith.constant 0 : i32
    return %c0_i32, %arg1 : i32, i32
  }
  func.func @transform_5(%arg0: i32, %arg1: i32) -> (i32, i32) {
    %c0_i32 = arith.constant 0 : i32
    %c0_i32_0 = arith.constant 0 : i32
    return %c0_i32, %arg1 : i32, i32
  }
  func.func @transform_6(%arg0: i32, %arg1: i32) -> (i32, i32) {
    %c0_i32 = arith.constant 0 : i32
    %c0_i32_0 = arith.constant 0 : i32
    return %arg1, %c0_i32 : i32, i32
  }
  func.func @transform_7(%arg0: i32, %arg1: i32) -> (i32, i32) {
    %c0_i32 = arith.constant 0 : i32
    %c0_i32_0 = arith.constant 0 : i32
    %c0_i32_1 = arith.constant 0 : i32
    return %c0_i32, %c0_i32_0 : i32, i32
  }
  func.func @transform_8(%arg0: i32, %arg1: i32) -> (i32, i32) {
    %c0_i32 = arith.constant 0 : i32
    %c0_i32_0 = arith.constant 0 : i32
    return %arg0, %c0_i32 : i32, i32
  }
}

module attributes {stable_mosaic.version = 11 : i64} {
  func.func @_rel_ffn_kernel(%arg0: i32, %arg1: i32, %arg2: memref<128x1xi32, #tpu.memory_space<vmem>>, %arg3: memref<128x1xi32, #tpu.memory_space<vmem>>, %arg4: memref<128x128xbf16, #tpu.memory_space<vmem>>, %arg5: memref<128x128xbf16, #tpu.memory_space<vmem>>, %arg6: memref<128x128xbf16, #tpu.memory_space<vmem>>, %arg7: memref<1x128xf32, #tpu.memory_space<vmem>>, %arg8: memref<128x128xbf16, #tpu.memory_space<vmem>>, %arg9: memref<1x128xf32, #tpu.memory_space<vmem>>, %arg10: memref<128x128xf32, #tpu.memory_space<vmem>>, %arg11: memref<128x128xbf16, #tpu.memory_space<vmem>>, %arg12: memref<128x128xbf16, #tpu.memory_space<vmem>>) attributes {dimension_semantics = [#tpu.dimension_semantics<parallel>, #tpu.dimension_semantics<arbitrary>], iteration_bounds = array<i64: 1, 1>, scalar_prefetch = 0 : i64, scratch_operands = 2 : i64, tpu.core_type = #tpu.core_type<tc>, window_params = [{transform_indices = @transform_0, window_bounds = array<i64: 128, 1>}, {transform_indices = @transform_1, window_bounds = array<i64: 128, 1>}, {pipeline_mode = #tpu.pipeline_mode<synchronous>, transform_indices = @transform_2, window_bounds = array<i64: 128, 128>}, {transform_indices = @transform_3, window_bounds = array<i64: 128, 128>}, {transform_indices = @transform_4, window_bounds = array<i64: 128, 128>}, {transform_indices = @transform_5, window_bounds = array<i64: 1, 128>}, {transform_indices = @transform_6, window_bounds = array<i64: 128, 128>}, {pipeline_mode = #tpu.pipeline_mode<synchronous>, transform_indices = @transform_7, window_bounds = array<i64: 1, 128>}, {transform_indices = @transform_8, window_bounds = array<i64: 128, 128>}]} {
    %c0_i32 = arith.constant 0 : i32
    %0 = arith.cmpi eq, %arg1, %c0_i32 : i32
    %1 = arith.extui %0 : i1 to i32
    %c0_i32_0 = arith.constant 0 : i32
    %2 = arith.cmpi ne, %1, %c0_i32_0 : i32
    scf.if %2 {
      %c0_21 = arith.constant 0 : index
      %c0_22 = arith.constant 0 : index
      %24 = vector.load %arg2[%c0_21, %c0_22] : memref<128x1xi32, #tpu.memory_space<vmem>>, vector<128x1xi32>
      %c0_23 = arith.constant 0 : index
      %c0_24 = arith.constant 0 : index
      %25 = vector.load %arg3[%c0_23, %c0_24] : memref<128x1xi32, #tpu.memory_space<vmem>>, vector<128x1xi32>
      %26 = tpu.concatenate %24, %25 in 0 : vector<128x1xi32>, vector<128x1xi32> -> vector<256x1xi32>
      %27 = tpu.iota {dimensions = array<i32: 1>} : vector<256x128xi32>
      %28 = vector.broadcast %26 : vector<256x1xi32> to vector<256x128xi32>
      %29 = arith.cmpi eq, %27, %28 : vector<256x128xi32>
      %30 = arith.extui %29 : vector<256x128xi1> to vector<256x128xi32>
      %31 = arith.sitofp %30 : vector<256x128xi32> to vector<256x128xf32>
      %32 = arith.truncf %31 : vector<256x128xf32> to vector<256x128xbf16>
      %c0_25 = arith.constant 0 : index
      %c0_26 = arith.constant 0 : index
      %33 = vector.load %arg4[%c0_25, %c0_26] : memref<128x128xbf16, #tpu.memory_space<vmem>>, vector<128x128xbf16>
      %cst_27 = arith.constant dense<0.000000e+00> : vector<256x128xf32>
      %34 = tpu.matmul %32, %33, %cst_27 {dimension_numbers = #tpu.dot_dimension_numbers<[1], [0], [0], [1], [0, 0, 1, 1], [], []>} : vector<256x128xbf16>, vector<128x128xbf16>, vector<256x128xf32> -> vector<256x128xf32>
      %35 = vector.extract_strided_slice %34 {offsets = [0, 0], sizes = [128, 128], strides = [1, 1]} : vector<256x128xf32> to vector<128x128xf32>
      %36 = arith.truncf %35 : vector<128x128xf32> to vector<128x128xbf16>
      %c0_28 = arith.constant 0 : index
      %c0_29 = arith.constant 0 : index
      %37 = vector.load %arg11[%c0_28, %c0_29] : memref<128x128xbf16, #tpu.memory_space<vmem>>, vector<128x128xbf16>
      tpu.vector_store %arg11[%c0_28, %c0_29], %36 {strides = array<i32>} : memref<128x128xbf16, #tpu.memory_space<vmem>>, vector<128x128xbf16>,
      %38 = vector.extract_strided_slice %34 {offsets = [128, 0], sizes = [128, 128], strides = [1, 1]} : vector<256x128xf32> to vector<128x128xf32>
      %39 = arith.truncf %38 : vector<128x128xf32> to vector<128x128xbf16>
      %c0_30 = arith.constant 0 : index
      %c0_31 = arith.constant 0 : index
      %40 = vector.load %arg12[%c0_30, %c0_31] : memref<128x128xbf16, #tpu.memory_space<vmem>>, vector<128x128xbf16>
      tpu.vector_store %arg12[%c0_30, %c0_31], %39 {strides = array<i32>} : memref<128x128xbf16, #tpu.memory_space<vmem>>, vector<128x128xbf16>,
      %cst_32 = arith.constant 0.000000e+00 : f32
      %41 = vector.broadcast %cst_32 : f32 to vector<128x128xf32>
      %c0_33 = arith.constant 0 : index
      %c0_34 = arith.constant 0 : index
      %42 = vector.load %arg10[%c0_33, %c0_34] : memref<128x128xf32, #tpu.memory_space<vmem>>, vector<128x128xf32>
      tpu.vector_store %arg10[%c0_33, %c0_34], %41 {strides = array<i32>} : memref<128x128xf32, #tpu.memory_space<vmem>>, vector<128x128xf32>,
    } else {
    }
    %c0 = arith.constant 0 : index
    %c0_1 = arith.constant 0 : index
    %3 = vector.load %arg11[%c0, %c0_1] : memref<128x128xbf16, #tpu.memory_space<vmem>>, vector<128x128xbf16>
    %c0_2 = arith.constant 0 : index
    %c0_3 = arith.constant 0 : index
    %4 = vector.load %arg5[%c0_2, %c0_3] : memref<128x128xbf16, #tpu.memory_space<vmem>>, vector<128x128xbf16>
    %cst = arith.constant dense<0.000000e+00> : vector<128x128xf32>
    %5 = tpu.matmul %3, %4, %cst {dimension_numbers = #tpu.dot_dimension_numbers<[1], [0], [0], [1], [0, 0, 1, 1], [], []>} : vector<128x128xbf16>, vector<128x128xbf16>, vector<128x128xf32> -> vector<128x128xf32>
    %c0_4 = arith.constant 0 : index
    %c0_5 = arith.constant 0 : index
    %6 = vector.load %arg12[%c0_4, %c0_5] : memref<128x128xbf16, #tpu.memory_space<vmem>>, vector<128x128xbf16>
    %c0_6 = arith.constant 0 : index
    %c0_7 = arith.constant 0 : index
    %7 = vector.load %arg6[%c0_6, %c0_7] : memref<128x128xbf16, #tpu.memory_space<vmem>>, vector<128x128xbf16>
    %cst_8 = arith.constant dense<0.000000e+00> : vector<128x128xf32>
    %8 = tpu.matmul %6, %7, %cst_8 {dimension_numbers = #tpu.dot_dimension_numbers<[1], [0], [0], [1], [0, 0, 1, 1], [], []>} : vector<128x128xbf16>, vector<128x128xbf16>, vector<128x128xf32> -> vector<128x128xf32>
    %9 = arith.addf %5, %8 : vector<128x128xf32>
    %c0_9 = arith.constant 0 : index
    %c0_10 = arith.constant 0 : index
    %10 = vector.load %arg7[%c0_9, %c0_10] : memref<1x128xf32, #tpu.memory_space<vmem>>, vector<1x128xf32>
    %11 = vector.broadcast %10 : vector<1x128xf32> to vector<128x128xf32>
    %12 = arith.addf %9, %11 : vector<128x128xf32>
    %cst_11 = arith.constant 0.000000e+00 : f32
    %13 = vector.broadcast %cst_11 : f32 to vector<128x128xf32>
    %14 = arith.maximumf %12, %13 : vector<128x128xf32>
    %15 = arith.truncf %14 : vector<128x128xf32> to vector<128x128xbf16>
    %c0_12 = arith.constant 0 : index
    %c0_13 = arith.constant 0 : index
    %16 = vector.load %arg10[%c0_12, %c0_13] : memref<128x128xf32, #tpu.memory_space<vmem>>, vector<128x128xf32>
    %c0_14 = arith.constant 0 : index
    %c0_15 = arith.constant 0 : index
    %17 = vector.load %arg8[%c0_14, %c0_15] : memref<128x128xbf16, #tpu.memory_space<vmem>>, vector<128x128xbf16>
    %cst_16 = arith.constant dense<0.000000e+00> : vector<128x128xf32>
    %18 = tpu.matmul %15, %17, %cst_16 {dimension_numbers = #tpu.dot_dimension_numbers<[1], [0], [0], [1], [0, 0, 1, 1], [], []>} : vector<128x128xbf16>, vector<128x128xbf16>, vector<128x128xf32> -> vector<128x128xf32>
    %19 = arith.addf %16, %18 : vector<128x128xf32>
    %c0_17 = arith.constant 0 : index
    %c0_18 = arith.constant 0 : index
    %20 = vector.load %arg10[%c0_17, %c0_18] : memref<128x128xf32, #tpu.memory_space<vmem>>, vector<128x128xf32>
    tpu.vector_store %arg10[%c0_17, %c0_18], %19 {strides = array<i32>} : memref<128x128xf32, #tpu.memory_space<vmem>>, vector<128x128xf32>,
    %c0_i32_19 = arith.constant 0 : i32
    %21 = arith.cmpi eq, %arg1, %c0_i32_19 : i32
    %22 = arith.extui %21 : i1 to i32
    %c0_i32_20 = arith.constant 0 : i32
    %23 = arith.cmpi ne, %22, %c0_i32_20 : i32
    scf.if %23 {
      %c0_21 = arith.constant 0 : index
      %c0_22 = arith.constant 0 : index
      %24 = vector.load %arg10[%c0_21, %c0_22] : memref<128x128xf32, #tpu.memory_space<vmem>>, vector<128x128xf32>
      %c0_23 = arith.constant 0 : index
      %c0_24 = arith.constant 0 : index
      %25 = vector.load %arg9[%c0_23, %c0_24] : memref<1x128xf32, #tpu.memory_space<vmem>>, vector<1x128xf32>
      %26 = vector.broadcast %25 : vector<1x128xf32> to vector<128x128xf32>
      %27 = arith.addf %24, %26 : vector<128x128xf32>
      %c0_25 = arith.constant 0 : index
      %c0_26 = arith.constant 0 : index
      %28 = vector.load %arg10[%c0_25, %c0_26] : memref<128x128xf32, #tpu.memory_space<vmem>>, vector<128x128xf32>
      tpu.vector_store %arg10[%c0_25, %c0_26], %27 {strides = array<i32>} : memref<128x128xf32, #tpu.memory_space<vmem>>, vector<128x128xf32>,
    } else {
    }
    return
  }
  func.func @transform_0(%arg0: i32, %arg1: i32) -> (i32, i32) {
    %c0_i32 = arith.constant 0 : i32
    %c0_i32_0 = arith.constant 0 : i32
    return %arg0, %c0_i32 : i32, i32
  }
  func.func @transform_1(%arg0: i32, %arg1: i32) -> (i32, i32) {
    %c0_i32 = arith.constant 0 : i32
    %c0_i32_0 = arith.constant 0 : i32
    return %arg0, %c0_i32 : i32, i32
  }
  func.func @transform_2(%arg0: i32, %arg1: i32) -> (i32, i32) {
    %c0_i32 = arith.constant 0 : i32
    %c0_i32_0 = arith.constant 0 : i32
    %c0_i32_1 = arith.constant 0 : i32
    return %c0_i32, %c0_i32_0 : i32, i32
  }
  func.func @transform_3(%arg0: i32, %arg1: i32) -> (i32, i32) {
    %c0_i32 = arith.constant 0 : i32
    %c0_i32_0 = arith.constant 0 : i32
    return %c0_i32, %arg1 : i32, i32
  }
  func.func @transform_4(%arg0: i32, %arg1: i32) -> (i32, i32) {
    %c0_i32 = arith.constant 0 : i32
    %c0_i32_0 = arith.constant 0 : i32
    return %c0_i32, %arg1 : i32, i32
  }
  func.func @transform_5(%arg0: i32, %arg1: i32) -> (i32, i32) {
    %c0_i32 = arith.constant 0 : i32
    %c0_i32_0 = arith.constant 0 : i32
    return %c0_i32, %arg1 : i32, i32
  }
  func.func @transform_6(%arg0: i32, %arg1: i32) -> (i32, i32) {
    %c0_i32 = arith.constant 0 : i32
    %c0_i32_0 = arith.constant 0 : i32
    return %arg1, %c0_i32 : i32, i32
  }
  func.func @transform_7(%arg0: i32, %arg1: i32) -> (i32, i32) {
    %c0_i32 = arith.constant 0 : i32
    %c0_i32_0 = arith.constant 0 : i32
    %c0_i32_1 = arith.constant 0 : i32
    return %c0_i32, %c0_i32_0 : i32, i32
  }
  func.func @transform_8(%arg0: i32, %arg1: i32) -> (i32, i32) {
    %c0_i32 = arith.constant 0 : i32
    %c0_i32_0 = arith.constant 0 : i32
    return %arg0, %c0_i32 : i32, i32
  }
}

</mosaic_0001>

<bundles_post_ra>
// kernel: tpu_custom_call.1
= control target key start
LH: loop header
LB: loop body
LE: loop exit
PB: predicated region body
PF: predicated region fallthrough
CT: control target
= control target key end

     0   :  { %v1628_v2 = vmov 0   ;;  %s2046_s0 = inlined_call_operand.vmem [shape: s32[128,1], index: 0, kind: input, shape index: {}]   ;;  %s2047_s1 = inlined_call_operand.vmem [shape: s32[128,1], index: 1, kind: input, shape index: {}]   ;;  %s2048_s2 = inlined_call_operand.vmem [shape: bf16[128,128], index: 2, kind: input, shape index: {}]   ;;  %s2049_s3 = inlined_call_operand.vmem [shape: bf16[128,128], index: 3, kind: input, shape index: {}]   ;;  %s2050_s4 = inlined_call_operand.vmem [shape: bf16[128,128], index: 4, kind: input, shape index: {}]   ;;  %s2051_s5 = inlined_call_operand.vmem [shape: f32[1,128], index: 5, kind: input, shape index: {}]   ;;  %s2052_s6 = inlined_call_operand.vmem [shape: bf16[128,128], index: 6, kind: input, shape index: {}]   ;;  %s2053_s7 = inlined_call_operand.vmem [shape: f32[1,128], index: 7, kind: input, shape index: {}]   ;;  %s2054_s8 = inlined_call_operand.hbm [shape: f32[128,128], index: 8, kind: output, shape index: {}]  }
   0x1   :  { %v37_v0 = vld [vmem:[%s2046_s0 + $0x10] sm:$0xff]  ;;  %v35_v1 = vld [vmem:[%s2046_s0] sm:$0xff]  ;;  %1571 = vset.pattern.permute.xlu1 %v1628_v2  ;;  %1570 = vset.pattern.permute.xlu0 %v1628_v2  ;;  %v38_v3 = vld [vmem:[%s2046_s0 + $0x18] sm:$0xff] }
   0x2   :  { %76 = vperm.xlu1 %1571, %v37_v0   ;;  %70 = vperm.xlu0 %1570, %v35_v1   ;;  %v36_v4 = vld [vmem:[%s2046_s0 + $0x8] sm:$0xff]  ;;  %v39_v6 = vld [vmem:[%s2046_s0 + $0x20] sm:$0xff]  ;;  %v42_v7 = vld [vmem:[%s2046_s0 + $0x38] sm:$0xff] }
   0x3   :  { %v40_v5 = vld [vmem:[%s2046_s0 + $0x28] sm:$0xff]  ;;  %v41_v8 = vld [vmem:[%s2046_s0 + $0x30] sm:$0xff]  ;;  %v1572_v9 = vld [vmem:[%s2048_s2] sm:$0xff]  }
   0x4   :  { %v1573_v10 = vld [vmem:[%s2048_s2 + $0x8] sm:$0xff]   ;;  %1388 = vmatprep.subr.bf16.mxu0 %v1572_v9  ;;  %v43_v12 = vld [vmem:[%s2046_s0 + $0x40] sm:$0xff]  ;;  %v1574_v13 = vld [vmem:[%s2048_s2 + $0x10] sm:$0xff]  }
   0x5   :  { %v44_v11 = vld [vmem:[%s2046_s0 + $0x48] sm:$0xff]  ;;  %1389 = vmatpush3.bf16.msra.mxu0 %v1572_v9  ;;  %v46_v14 = vld [vmem:[%s2046_s0 + $0x58] sm:$0xff]  ;;  %v45_v15 = vld [vmem:[%s2046_s0 + $0x50] sm:$0xff] }
   0x6   :  { %79 = vperm.xlu1 %1571, %v38_v3   ;;  %73 = vperm.xlu0 %1570, %v36_v4   ;;  %v1575_v16 = vld [vmem:[%s2048_s2 + $0x18] sm:$0xff]   ;;  %v48_v17 = vld [vmem:[%s2046_s0 + $0x68] sm:$0xff]  ;;  %v47_v18 = vld [vmem:[%s2046_s0 + $0x60] sm:$0xff] }
   0x7   :  { %1390 = vmatprep.subr.bf16.mxu0 %v1573_v10  ;;  %v1576_v19 = vld [vmem:[%s2048_s2 + $0x20] sm:$0xff]   ;;  %v50_v20 = vld [vmem:[%s2046_s0 + $0x78] sm:$0xff]  ;;  %v49_v21 = vld [vmem:[%s2046_s0 + $0x70] sm:$0xff] }
   0x8   :  { %v1577_v22 = vld [vmem:[%s2048_s2 + $0x28] sm:$0xff]   ;;  %v51_v24 = vld [vmem:[%s2047_s1] sm:$0xff]  ;;  %v1578_v25 = vld [vmem:[%s2048_s2 + $0x30] sm:$0xff]  }
   0x9   :  { %1391 = vmatpush3.bf16.msra.mxu0 %v1573_v10  ;;  %v52_v23 = vld [vmem:[%s2047_s1 + $0x8] sm:$0xff] }
   0xa   :  { %85 = vperm.xlu1 %1571, %v40_v5   ;;  %82 = vperm.xlu0 %1570, %v39_v6  }
   0xb   :  { %1392 = vmatprep.subr.bf16.mxu0 %v1574_v13 }
   0xd   :  { %1393 = vmatpush3.bf16.msra.mxu0 %v1574_v13 }
   0xe   :  { %91 = vperm.xlu1 %1571, %v42_v7   ;;  %88 = vperm.xlu0 %1570, %v41_v8  }
   0xf   :  { %1394 = vmatprep.subr.bf16.mxu0 %v1575_v16 }
  0x11   :  { %1395 = vmatpush3.bf16.msra.mxu0 %v1575_v16 }
  0x12   :  { %97 = vperm.xlu1 %1571, %v44_v11   ;;  %94 = vperm.xlu0 %1570, %v43_v12  }
  0x13   :  { %1396 = vmatprep.subr.bf16.mxu0 %v1576_v19 }
  0x15   :  { %1397 = vmatpush3.bf16.msra.mxu0 %v1576_v19 }
  0x16   :  { %103 = vperm.xlu1 %1571, %v46_v14   ;;  %100 = vperm.xlu0 %1570, %v45_v15  }
  0x17   :  { %1398 = vmatprep.subr.bf16.mxu0 %v1577_v22 }
  0x1a   :  { %109 = vperm.xlu1 %1571, %v48_v17   ;;  %106 = vperm.xlu0 %1570, %v47_v18  }
  0x1e   :  { %115 = vperm.xlu1 %1571, %v50_v20   ;;  %112 = vperm.xlu0 %1570, %v49_v21  }
  0x22   :  { %121 = vperm.xlu1 %1571, %v52_v23   ;;  %118 = vperm.xlu0 %1570, %v51_v24  }
  0x23   :  { %13 = vsyncpa [#allocation5], 0  ;;  %v54_v26 = vld [vmem:[%s2047_s1 + $0x18] sm:$0xff]  ;;  %v53_v27 = vld [vmem:[%s2047_s1 + $0x10] sm:$0xff]  ;;  %1399 = vmatpush3.bf16.msra.mxu0 %v1577_v22  ;;  %v67_v41 = vlaneseq  ;;  %v1629_v47 = vmov 1.0|1.0  }
  0x24   :  { %1400 = vmatprep.subr.bf16.mxu0 %v1578_v25  ;;  %v1579_v28 = vld [vmem:[%s2048_s2 + $0x38] sm:$0xff]   ;;  %v56_v29 = vld [vmem:[%s2047_s1 + $0x28] sm:$0xff]  ;;  %v55_v30 = vld [vmem:[%s2047_s1 + $0x20] sm:$0xff] }
  0x25   :  { %v58_v31 = vld [vmem:[%s2047_s1 + $0x38] sm:$0xff]  ;;  %v57_v32 = vld [vmem:[%s2047_s1 + $0x30] sm:$0xff]  ;;  %v60_v33 = vld [vmem:[%s2047_s1 + $0x48] sm:$0xff]  ;;  %v1798_v44 = vand.u32 127, %v67_v41 }
  0x26   :  { %127 = vperm.xlu1 %1571, %v54_v26   ;;  %124 = vperm.xlu0 %1570, %v53_v27   ;;  %v59_v34 = vld [vmem:[%s2047_s1 + $0x40] sm:$0xff]  ;;  %v62_v35 = vld [vmem:[%s2047_s1 + $0x58] sm:$0xff]  ;;  %v61_v36 = vld [vmem:[%s2047_s1 + $0x50] sm:$0xff] }
  0x27   :  { %1401 = vmatpush3.bf16.msra.mxu0 %v1578_v25  ;;  %v64_v37 = vld [vmem:[%s2047_s1 + $0x68] sm:$0xff]  ;;  %v63_v38 = vld [vmem:[%s2047_s1 + $0x60] sm:$0xff]  ;;  %v66_v39 = vld [vmem:[%s2047_s1 + $0x78] sm:$0xff] }
  0x28   :  { %1402 = vmatprep.subr.bf16.mxu0 %v1579_v28  ;;  %v65_v40 = vld [vmem:[%s2047_s1 + $0x70] sm:$0xff]  ;;  %v1580_v12 = vld [vmem:[%s2050_s4] sm:$0xff]   ;;  %v1581_v13 = vld [vmem:[%s2050_s4 + $0x8] sm:$0xff]  }
  0x29   :  { %1436 = vmatprep.subr.bf16.mxu1 %v1580_v12  ;;  %v1582_v14 = vld [vmem:[%s2050_s4 + $0x10] sm:$0xff]   ;;  %v1583_v15 = vld [vmem:[%s2050_s4 + $0x18] sm:$0xff]   ;;  %v1584_v16 = vld [vmem:[%s2050_s4 + $0x20] sm:$0xff]  }
  0x2a   :  { %133 = vperm.xlu1 %1571, %v56_v29   ;;  %130 = vperm.xlu0 %1570, %v55_v30   ;;  %v1585_v17 = vld [vmem:[%s2050_s4 + $0x28] sm:$0xff]   ;;  %v1586_v18 = vld [vmem:[%s2050_s4 + $0x30] sm:$0xff]   ;;  %v1587_v19 = vld [vmem:[%s2050_s4 + $0x38] sm:$0xff]  }
  0x2b   :  { %1403 = vmatpush3.bf16.msra.mxu0 %v1579_v28  ;;  %1437 = vmatpush3.bf16.msra.mxu1 %v1580_v12  ;;  %v1588_v20 = vld [vmem:[%s2049_s3] sm:$0xff]   ;;  %v1883_v22 = vld [vmem:[%s2052_s6 + $0x8] sm:$0xff]   ;;  %v1891_v23 = vld [vmem:[%s2052_s6 + $0x10] sm:$0xff]  }
  0x2c   :  { %1438 = vmatprep.subr.bf16.mxu1 %v1581_v13  ;;  %v1878_v21 = vld [vmem:[%s2052_s6] sm:$0xff]   ;;  %v1898_v24 = vld [vmem:[%s2052_s6 + $0x18] sm:$0xff]   ;;  %v1912_v26 = vld [vmem:[%s2052_s6 + $0x28] sm:$0xff]  }
  0x2d   :  { %1500 = vmatprep.subr.bf16.mxu0 %v1878_v21  ;;  %v1905_v25 = vld [vmem:[%s2052_s6 + $0x20] sm:$0xff]   ;;  %v1594_v12 = vld [vmem:[%s2049_s3 + $0x30] sm:$0xff]  }
  0x2e   :  { %139 = vperm.xlu1 %1571, %v58_v31   ;;  %136 = vperm.xlu0 %1570, %v57_v32  }
  0x2f   :  { %1439 = vmatpush3.bf16.msra.mxu1 %v1581_v13 }
  0x30   :  { %1440 = vmatprep.subr.bf16.mxu1 %v1582_v14 }
  0x32   :  { %145 = vperm.xlu1 %1571, %v60_v33   ;;  %142 = vperm.xlu0 %1570, %v59_v34  }
  0x33   :  { %1441 = vmatpush3.bf16.msra.mxu1 %v1582_v14 }
  0x34   :  { %1442 = vmatprep.subr.bf16.mxu1 %v1583_v15 }
  0x36   :  { %151 = vperm.xlu1 %1571, %v62_v35   ;;  %148 = vperm.xlu0 %1570, %v61_v36  }
  0x37   :  { %1443 = vmatpush3.bf16.msra.mxu1 %v1583_v15 }
  0x38   :  { %1444 = vmatprep.subr.bf16.mxu1 %v1584_v16 }
  0x3a   :  { %157 = vperm.xlu1 %1571, %v64_v37   ;;  %154 = vperm.xlu0 %1570, %v63_v38  }
  0x3b   :  { %1445 = vmatpush3.bf16.msra.mxu1 %v1584_v16 }
  0x3c   :  { %1446 = vmatprep.subr.bf16.mxu1 %v1585_v17 }
  0x3e   :  { %163 = vperm.xlu1 %1571, %v66_v39   ;;  %160 = vperm.xlu0 %1570, %v65_v40  }
  0x3f   :  { %1447 = vmatpush3.bf16.msra.mxu1 %v1585_v17  ;;  %v1595_v17 = vld [vmem:[%s2049_s3 + $0x38] sm:$0xff]  }
  0x40   :  { %1448 = vmatprep.subr.bf16.mxu1 %v1586_v18 }
  0x43   :  { %1449 = vmatpush3.bf16.msra.mxu1 %v1586_v18  ;;  %v1602_v18 = vld [vmem:[%s2052_s6 + $0x30] sm:$0xff]  }
  0x44   :  { %1450 = vmatprep.subr.bf16.mxu1 %v1587_v19 }
  0x47   :  { %1451 = vmatpush3.bf16.msra.mxu1 %v1587_v19  ;;  %v1603_v19 = vld [vmem:[%s2052_s6 + $0x38] sm:$0xff]  }
  0x48   :  { %1468 = vmatprep.subr.bf16.mxu1 %v1588_v20 }
  0x81   :  { %v77_v42 = vpop.permute.xlu1 %76  ;;  %v71_v43 = vpop.permute.xlu0 %70 }
  0x82   :  { %vm167_vm0 = vcmp.eq.s32.totalorder %v1798_v44, %v77_v42  ;;  %vm165_vm3 = vcmp.eq.s32.totalorder %v1798_v44, %v71_v43 }
  0x85   :  { %v80_v45 = vpop.permute.xlu1 %79  ;;  %v74_v46 = vpop.permute.xlu0 %73 }
  0x86   :  { %vm168_vm1 = vcmp.eq.s32.totalorder %v1798_v44, %v80_v45  ;;  %vm166_vm2 = vcmp.eq.s32.totalorder %v1798_v44, %v74_v46 }
  0x87   :  { %vm1260_vm4 = vmpackc.low %vm168_vm1, %vm167_vm0 }
  0x88   :  { %vm1258_vm5 = vmpackc.low %vm166_vm2, %vm165_vm3 }
  0x89   :  { %1404 = vmatprep.mubr.msk.bf16.mxu0 %vm1258_vm5, %v1629_v47  ;;  %v86_v48 = vpop.permute.xlu1 %85  ;;  %v83_v49 = vpop.permute.xlu0 %82 }
  0x8a   :  { %vm170_vm6 = vcmp.eq.s32.totalorder %v1798_v44, %v86_v48  ;;  %1405 = vmatmul.mubr.msk.bf16.vlgmr.msra.gmra.mrb[0].mxu0 %vm1260_vm4, %v1629_v47  ;;  %vm169_vm7 = vcmp.eq.s32.totalorder %v1798_v44, %v83_v49 }
  0x8b   :  { %vm1262_vm8 = vmpackc.low %vm170_vm6, %vm169_vm7  ;;  %1501 = vmatpush3.bf16.msra.mxu0 %v1878_v21 }
  0x8c   :  { %1408 = vmatprep.mubr.msk.bf16.mxu0 %vm1262_vm8, %v1629_v47  ;;  %1502 = vmatprep.subr.bf16.mxu0 %v1883_v22 }
  0x8d   :  { %v92_v50 = vpop.permute.xlu1 %91  ;;  %v89_v51 = vpop.permute.xlu0 %88 }
  0x8e   :  { %vm172_vm9 = vcmp.eq.s32.totalorder %v1798_v44, %v92_v50  ;;  %vm171_vm10 = vcmp.eq.s32.totalorder %v1798_v44, %v89_v51 }
  0x8f   :  { %vm1264_vm11 = vmpackc.low %vm172_vm9, %vm171_vm10  ;;  %1503 = vmatpush3.bf16.msra.mxu0 %v1883_v22 }
  0x90   :  { %1504 = vmatprep.subr.bf16.mxu0 %v1891_v23 }
  0x91   :  { %v98_v52 = vpop.permute.xlu1 %97  ;;  %v95_v53 = vpop.permute.xlu0 %94 }
  0x92   :  { %vm174_vm12 = vcmp.eq.s32.totalorder %v1798_v44, %v98_v52  ;;  %1409 = vmatmul.mubr.msk.bf16.gmra.mrb[4].mxu0 %vm1264_vm11, %v1629_v47  ;;  %vm173_vm13 = vcmp.eq.s32.totalorder %v1798_v44, %v95_v53 }
  0x93   :  { %vm1266_vm14 = vmpackc.low %vm174_vm12, %vm173_vm13  ;;  %1505 = vmatpush3.bf16.msra.mxu0 %v1891_v23 }
  0x94   :  { %1412 = vmatprep.mubr.msk.bf16.mxu0 %vm1266_vm14, %v1629_v47  ;;  %1506 = vmatprep.subr.bf16.mxu0 %v1898_v24 }
  0x95   :  { %v104_v54 = vpop.permute.xlu1 %103  ;;  %v101_v55 = vpop.permute.xlu0 %100 }
  0x96   :  { %vm176_vm15 = vcmp.eq.s32.totalorder %v1798_v44, %v104_v54  ;;  %vm175_vm0 = vcmp.eq.s32.totalorder %v1798_v44, %v101_v55 }
  0x97   :  { %vm1268_vm1 = vmpackc.low %vm176_vm15, %vm175_vm0  ;;  %1507 = vmatpush3.bf16.msra.mxu0 %v1898_v24 }
  0x98   :  { %1508 = vmatprep.subr.bf16.mxu0 %v1905_v25 }
  0x99   :  { %v110_v56 = vpop.permute.xlu1 %109  ;;  %v107_v57 = vpop.permute.xlu0 %106 }
  0x9a   :  { %vm178_vm2 = vcmp.eq.s32.totalorder %v1798_v44, %v110_v56  ;;  %1413 = vmatmul.mubr.msk.bf16.gmra.mrb[8].mxu0 %vm1268_vm1, %v1629_v47  ;;  %vm177_vm3 = vcmp.eq.s32.totalorder %v1798_v44, %v107_v57  ;;  %v1589_v57 = vld [vmem:[%s2049_s3 + $0x8] sm:$0xff]  }
  0x9b   :  { %vm1270_vm4 = vmpackc.low %vm178_vm2, %vm177_vm3  ;;  %1509 = vmatpush3.bf16.msra.mxu0 %v1905_v25 }
  0x9c   :  { %1416 = vmatprep.mubr.msk.bf16.mxu0 %vm1270_vm4, %v1629_v47  ;;  %1510 = vmatprep.subr.bf16.mxu0 %v1912_v26 }
  0x9d   :  { %v116_v58 = vpop.permute.xlu1 %115  ;;  %v113_v59 = vpop.permute.xlu0 %112 }
  0x9e   :  { %vm180_vm5 = vcmp.eq.s32.totalorder %v1798_v44, %v116_v58  ;;  %vm179_vm6 = vcmp.eq.s32.totalorder %v1798_v44, %v113_v59 }
  0x9f   :  { %vm1272_vm7 = vmpackc.low %vm180_vm5, %vm179_vm6  ;;  %1511 = vmatpush3.bf16.msra.mxu0 %v1912_v26 }
  0xa0   :  { %1512 = vmatprep.subr.bf16.mxu0 %v1602_v18 }
  0xa1   :  { %v122_v60 = vpop.permute.xlu1 %121  ;;  %v119_v61 = vpop.permute.xlu0 %118 }
  0xa2   :  { %vm182_vm8 = vcmp.eq.s32.totalorder %v1798_v44, %v122_v60  ;;  %1417 = vmatmul.mubr.msk.bf16.gmra.mrb[12].mxu0 %vm1272_vm7, %v1629_v47  ;;  %vm181_vm9 = vcmp.eq.s32.totalorder %v1798_v44, %v119_v61  ;;  %v1590_v60 = vld [vmem:[%s2049_s3 + $0x10] sm:$0xff]  }
  0xa3   :  { %vm1274_vm10 = vmpackc.low %vm182_vm8, %vm181_vm9  ;;  %1513 = vmatpush3.bf16.msra.mxu0 %v1602_v18 }
  0xa4   :  { %1420 = vmatprep.mubr.msk.bf16.mxu0 %vm1274_vm10, %v1629_v47  ;;  %1514 = vmatprep.subr.bf16.mxu0 %v1603_v19 }
  0xa5   :  { %v128_v62 = vpop.permute.xlu1 %127  ;;  %v125_v63 = vpop.permute.xlu0 %124 }
  0xa6   :  { %vm184_vm11 = vcmp.eq.s32.totalorder %v1798_v44, %v128_v62  ;;  %vm183_vm12 = vcmp.eq.s32.totalorder %v1798_v44, %v125_v63 }
  0xa7   :  { %vm1276_vm13 = vmpackc.low %vm184_vm11, %vm183_vm12  ;;  %1515 = vmatpush3.bf16.msra.mxu0 %v1603_v19 }
  0xa9   :  { %v134_v0 = vpop.permute.xlu1 %133  ;;  %v131_v1 = vpop.permute.xlu0 %130 }
  0xaa   :  { %vm186_vm14 = vcmp.eq.s32.totalorder %v1798_v44, %v134_v0  ;;  %1421 = vmatmul.mubr.msk.bf16.gmra.mrb[16].mxu0 %vm1276_vm13, %v1629_v47  ;;  %vm185_vm15 = vcmp.eq.s32.totalorder %v1798_v44, %v131_v1  ;;  %v1591_v1 = vld [vmem:[%s2049_s3 + $0x18] sm:$0xff]  }
  0xab   :  { %vm1278_vm0 = vmpackc.low %vm186_vm14, %vm185_vm15 }
  0xac   :  { %1424 = vmatprep.mubr.msk.bf16.mxu0 %vm1278_vm0, %v1629_v47 }
  0xad   :  { %v140_v2 = vpop.permute.xlu1 %139  ;;  %v137_v3 = vpop.permute.xlu0 %136 }
  0xae   :  { %vm188_vm1 = vcmp.eq.s32.totalorder %v1798_v44, %v140_v2  ;;  %vm187_vm2 = vcmp.eq.s32.totalorder %v1798_v44, %v137_v3 }
  0xaf   :  { %vm1280_vm3 = vmpackc.low %vm188_vm1, %vm187_vm2 }
  0xb1   :  { %v146_v4 = vpop.permute.xlu1 %145  ;;  %v143_v5 = vpop.permute.xlu0 %142 }
  0xb2   :  { %vm190_vm4 = vcmp.eq.s32.totalorder %v1798_v44, %v146_v4  ;;  %1425 = vmatmul.mubr.msk.bf16.gmra.mrb[20].mxu0 %vm1280_vm3, %v1629_v47  ;;  %vm189_vm5 = vcmp.eq.s32.totalorder %v1798_v44, %v143_v5  ;;  %v1592_v4 = vld [vmem:[%s2049_s3 + $0x20] sm:$0xff]  }
  0xb3   :  { %vm1282_vm6 = vmpackc.low %vm190_vm4, %vm189_vm5 }
  0xb4   :  { %1428 = vmatprep.mubr.msk.bf16.mxu0 %vm1282_vm6, %v1629_v47 }
  0xb5   :  { %v152_v6 = vpop.permute.xlu1 %151  ;;  %v149_v7 = vpop.permute.xlu0 %148 }
  0xb6   :  { %vm192_vm7 = vcmp.eq.s32.totalorder %v1798_v44, %v152_v6  ;;  %vm191_vm8 = vcmp.eq.s32.totalorder %v1798_v44, %v149_v7 }
  0xb7   :  { %vm1284_vm9 = vmpackc.low %vm192_vm7, %vm191_vm8 }
  0xb9   :  { %v158_v8 = vpop.permute.xlu1 %157  ;;  %v155_v9 = vpop.permute.xlu0 %154 }
  0xba   :  { %vm194_vm10 = vcmp.eq.s32.totalorder %v1798_v44, %v158_v8  ;;  %1429 = vmatmul.mubr.msk.bf16.gmra.mrb[24].mxu0 %vm1284_vm9, %v1629_v47  ;;  %vm193_vm11 = vcmp.eq.s32.totalorder %v1798_v44, %v155_v9  ;;  %v1593_v9 = vld [vmem:[%s2049_s3 + $0x28] sm:$0xff]  }
  0xbb   :  { %vm1286_vm12 = vmpackc.low %vm194_vm10, %vm193_vm11 }
  0xbc   :  { %1432 = vmatprep.mubr.msk.bf16.mxu0 %vm1286_vm12, %v1629_v47 }
  0xbd   :  { %v164_v10 = vpop.permute.xlu1 %163  ;;  %v161_v11 = vpop.permute.xlu0 %160 }
  0xbe   :  { %vm196_vm13 = vcmp.eq.s32.totalorder %v1798_v44, %v164_v10  ;;  %vm195_vm14 = vcmp.eq.s32.totalorder %v1798_v44, %v161_v11 }
  0xbf   :  { %vm1288_vm15 = vmpackc.low %vm196_vm13, %vm195_vm14 }
  0xc2   :  { %1433 = vmatmul.mubr.msk.bf16.gmra.mrb[28].mxu0 %vm1288_vm15, %v1629_v47 }
 0x15d   :  { %v1917_v27 = vpop.f32.mrb[0].mxu0 }
 0x15e   :  { %v1919_v28 = vpop.f32.mrb[1].mxu0 }
 0x15f   :  { %v1921_v29 = vpop.f32.mrb[2].mxu0 }
 0x160   :  { %v503_v30 = vpack.c.bf16 %v1921_v29, %v1917_v27  ;;  %v1925_v31 = vpop.f32.mrb[3].mxu0 }
 0x161   :  { %v502_v32 = vpack.c.bf16 %v1925_v31, %v1919_v28 }
 0x165   :  { %v1929_v33 = vpop.f32.mrb[4].mxu0 }
 0x166   :  { %v1931_v34 = vpop.f32.mrb[5].mxu0 }
 0x167   :  { %v1933_v35 = vpop.f32.mrb[6].mxu0 }
 0x168   :  { %v505_v36 = vpack.c.bf16 %v1933_v35, %v1929_v33  ;;  %v1937_v37 = vpop.f32.mrb[7].mxu0 }
 0x169   :  { %v504_v38 = vpack.c.bf16 %v1937_v37, %v1931_v34 }
 0x16d   :  { %v1941_v39 = vpop.f32.mrb[8].mxu0 }
 0x16e   :  { %v1943_v40 = vpop.f32.mrb[9].mxu0 }
 0x16f   :  { %v1945_v41 = vpop.f32.mrb[10].mxu0 }
 0x170   :  { %v507_v42 = vpack.c.bf16 %v1945_v41, %v1941_v39  ;;  %v1949_v43 = vpop.f32.mrb[11].mxu0 }
 0x171   :  { %v506_v44 = vpack.c.bf16 %v1949_v43, %v1943_v40 }
 0x175   :  { %v1953_v45 = vpop.f32.mrb[12].mxu0 }
 0x176   :  { %v1955_v46 = vpop.f32.mrb[13].mxu0 }
 0x177   :  { %v1957_v47 = vpop.f32.mrb[14].mxu0 }
 0x178   :  { %v509_v48 = vpack.c.bf16 %v1957_v47, %v1953_v45  ;;  %v1961_v49 = vpop.f32.mrb[15].mxu0 }
 0x179   :  { %v508_v50 = vpack.c.bf16 %v1961_v49, %v1955_v46 }
 0x17d   :  { %v1422_v51 = vpop.f32.mrb[16].mxu0 }
 0x17e   :  { %v439_v52 = vpop.f32.mrb[17].mxu0 }
 0x17f   :  { %v1423_v53 = vpop.f32.mrb[18].mxu0 }
 0x180   :  { %v519_v54 = vpack.c.bf16 %v1423_v53, %v1422_v51  ;;  %v442_v55 = vpop.f32.mrb[19].mxu0 }
 0x181   :  { %v518_v56 = vpack.c.bf16 %v442_v55, %v439_v52 }
 0x183   :  { %1452 = vmatprep.mubr.bf16.mxu1 %v518_v56 }
 0x184   :  { %1453 = vmatmul.mubr.bf16.vlgmr.msra.gmra.mrb[0].mxu1 %v519_v54 }
 0x185   :  { %1469 = vmatpush3.bf16.msra.mxu1 %v1588_v20  ;;  %v1426_v58 = vpop.f32.mrb[20].mxu0  ;;  %v1306_v20 = vld [vmem:[%s2051_s5] ss:$0 sm:$0xff] }
 0x186   :  { %v455_v59 = vpop.f32.mrb[21].mxu0  ;;  %1470 = vmatprep.subr.bf16.mxu1 %v1589_v57 }
 0x187   :  { %v1427_v61 = vpop.f32.mrb[22].mxu0 }
 0x188   :  { %v521_v62 = vpack.c.bf16 %v1427_v61, %v1426_v58  ;;  %v458_v63 = vpop.f32.mrb[23].mxu0 }
 0x189   :  { %v520_v0 = vpack.c.bf16 %v458_v63, %v455_v59  ;;  %1471 = vmatpush3.bf16.msra.mxu1 %v1589_v57 }
 0x18a   :  { %1472 = vmatprep.subr.bf16.mxu1 %v1590_v60 }
 0x18b   :  { %1456 = vmatprep.mubr.bf16.mxu1 %v520_v0 }
 0x18c   :  { %1457 = vmatmul.mubr.bf16.gmra.mrb[4].mxu1 %v521_v62 }
 0x18d   :  { %1473 = vmatpush3.bf16.msra.mxu1 %v1590_v60  ;;  %v1430_v2 = vpop.f32.mrb[24].mxu0 }
 0x18e   :  { %v471_v3 = vpop.f32.mrb[25].mxu0  ;;  %1474 = vmatprep.subr.bf16.mxu1 %v1591_v1 }
 0x18f   :  { %v1431_v5 = vpop.f32.mrb[26].mxu0 }
 0x190   :  { %v523_v6 = vpack.c.bf16 %v1431_v5, %v1430_v2  ;;  %v474_v7 = vpop.f32.mrb[27].mxu0 }
 0x191   :  { %v522_v8 = vpack.c.bf16 %v474_v7, %v471_v3  ;;  %1475 = vmatpush3.bf16.msra.mxu1 %v1591_v1 }
 0x192   :  { %1476 = vmatprep.subr.bf16.mxu1 %v1592_v4 }
 0x193   :  { %1460 = vmatprep.mubr.bf16.mxu1 %v522_v8 }
 0x194   :  { %1461 = vmatmul.mubr.bf16.gmra.mrb[8].mxu1 %v523_v6 }
 0x195   :  { %1477 = vmatpush3.bf16.msra.mxu1 %v1592_v4  ;;  %v1434_v10 = vpop.f32.mrb[28].mxu0 }
 0x196   :  { %v487_v11 = vpop.f32.mrb[29].mxu0  ;;  %1478 = vmatprep.subr.bf16.mxu1 %v1593_v9 }
 0x197   :  { %v1435_v13 = vpop.f32.mrb[30].mxu0 }
 0x198   :  { %v525_v14 = vpack.c.bf16 %v1435_v13, %v1434_v10  ;;  %v490_v15 = vpop.f32.mrb[31].mxu0 }
 0x199   :  { %v524_v16 = vpack.c.bf16 %v490_v15, %v487_v11  ;;  %1479 = vmatpush3.bf16.msra.mxu1 %v1593_v9 }
 0x19a   :  { %1480 = vmatprep.subr.bf16.mxu1 %v1594_v12 }
 0x19b   :  { %1464 = vmatprep.mubr.bf16.mxu1 %v524_v16 }
 0x19c   :  { %1465 = vmatmul.mubr.bf16.gmra.mrb[12].mxu1 %v525_v14  ;;  %v1315_v14 = vld [vmem:[%s2053_s7] ss:$0 sm:$0xff]  ;;  %s1630_s7 = smov [#allocation4]  }
 0x19d   :  { %1481 = vmatpush3.bf16.msra.mxu1 %v1594_v12  ;;  %1484 = vmatprep.mubr.bf16.mxu1 %v502_v32  ;;  %s1207_s13 = sshll.u32 %s1630_s7, 4  ;;  %s1208_s13 = int_to_ptr.vmem [resolvable:$true] %s1207_s13 }
 0x19e   :  { %1482 = vmatprep.subr.bf16.mxu1 %v1595_v17  ;;  %s1604_s14 = scalar_lea.vmem %s1208_s13, 2048  ;;  %p1609_p1 = scmp.lt.s32.totalorder %s1208_s13, %s1208_s13 }
 0x19f   :  { %p1605_p0 = scmp.ne.s32.totalorder %s1208_s13, %s1604_s14  ;;  %p1610_p2 = scmp.lt.s32.totalorder %s1604_s14, %s1604_s14 }
 0x1a1   :  { %1483 = vmatpush3.bf16.msra.mxu1 %v1595_v17  ;;  %p1611_p3 = por %p1610_p2, %p1609_p1 }
 0x1a2   :  { %1532 = vmatprep.subr.bf16.mxu1 %v1878_v21 }
 0x1a3   :  { %p1612_p4 = pnand %p1611_p3, %p1605_p0 }
 0x1a4   :  { %1485 = vmatmul.mubr.bf16.vlgmr.msra.gmra.mrb[0].mxu1 %v503_v30 }
 0x1a5   :  { %1488 = vmatprep.mubr.bf16.mxu1 %v504_v38  ;;  %1540 = vmatpush3.bf16.msra.mxu1 %v1878_v21 }
 0x1a6   :  { %1533 = vmatprep.subr.bf16.mxu1 %v1883_v22 }
 0x1a9   :  { %1541 = vmatpush3.bf16.msra.mxu1 %v1883_v22 }
 0x1aa   :  { %1534 = vmatprep.subr.bf16.mxu1 %v1891_v23 }
 0x1ac   :  { %1489 = vmatmul.mubr.bf16.gmra.mrb[4].mxu1 %v505_v36 }
 0x1ad   :  { %1492 = vmatprep.mubr.bf16.mxu1 %v506_v44  ;;  %1542 = vmatpush3.bf16.msra.mxu1 %v1891_v23 }
 0x1ae   :  { %1535 = vmatprep.subr.bf16.mxu1 %v1898_v24 }
 0x1b1   :  { %1543 = vmatpush3.bf16.msra.mxu1 %v1898_v24 }
 0x1b2   :  { %1536 = vmatprep.subr.bf16.mxu1 %v1905_v25 }
 0x1b4   :  { %1493 = vmatmul.mubr.bf16.gmra.mrb[8].mxu1 %v507_v42 }
 0x1b5   :  { %1496 = vmatprep.mubr.bf16.mxu1 %v508_v50  ;;  %1544 = vmatpush3.bf16.msra.mxu1 %v1905_v25 }
 0x1b6   :  { %1537 = vmatprep.subr.bf16.mxu1 %v1912_v26 }
 0x1b9   :  { %1545 = vmatpush3.bf16.msra.mxu1 %v1912_v26 }
 0x1ba   :  { %1538 = vmatprep.subr.bf16.mxu1 %v1602_v18 }
 0x1bc   :  { %1497 = vmatmul.mubr.bf16.gmra.mrb[12].mxu1 %v509_v48 }
 0x1bd   :  { %1546 = vmatpush3.bf16.msra.mxu1 %v1602_v18 }
 0x1be   :  { %1539 = vmatprep.subr.bf16.mxu1 %v1603_v19 }
 0x1c1   :  { %1547 = vmatpush3.bf16.msra.mxu1 %v1603_v19 }
 0x277   :  { %v1486_v21 = vpop.f32.mrb[0].mxu1 }
 0x278   :  { %v897_v22 = vadd.f32 %v1486_v21, %v1306_v20  ;;  %v825_v23 = vpop.f32.mrb[1].mxu1 }
 0x279   :  { %v895_v24 = vadd.f32 %v1306_v20, %v825_v23  ;;  %v1487_v25 = vpop.f32.mrb[2].mxu1 }
 0x27a   :  { %v898_v26 = vadd.f32 %v1487_v25, %v1306_v20  ;;  %v828_v27 = vpop.f32.mrb[3].mxu1  ;;  %v913_v29 = vmax.f32 %v897_v22, 0.0 }
 0x27b   :  { %v896_v28 = vadd.f32 %v1306_v20, %v828_v27  ;;  %v911_v31 = vmax.f32 %v895_v24, 0.0 }
 0x27c   :  { %v914_v30 = vmax.f32 %v898_v26, 0.0 }
 0x27d   :  { %v912_v32 = vmax.f32 %v896_v28, 0.0 }
 0x27e   :  { %v928_v33 = vpack.c.bf16 %v914_v30, %v913_v29 }
 0x27f   :  { %v927_v34 = vpack.c.bf16 %v912_v32, %v911_v31  ;;  %v1490_v35 = vpop.f32.mrb[4].mxu1 }
 0x280   :  { %v901_v36 = vadd.f32 %v1490_v35, %v1306_v20  ;;  %v841_v37 = vpop.f32.mrb[5].mxu1 }
 0x281   :  { %v899_v38 = vadd.f32 %v1306_v20, %v841_v37  ;;  %v1491_v39 = vpop.f32.mrb[6].mxu1  ;;  %1516 = vmatprep.mubr.bf16.mxu0 %v927_v34 }
 0x282   :  { %v902_v40 = vadd.f32 %v1491_v39, %v1306_v20  ;;  %v844_v41 = vpop.f32.mrb[7].mxu1  ;;  %1517 = vmatmul.mubr.bf16.vlgmr.msra.gmra.mrb[32].mxu0 %v928_v33  ;;  %v917_v43 = vmax.f32 %v901_v36, 0.0 }
 0x283   :  { %v900_v42 = vadd.f32 %v1306_v20, %v844_v41  ;;  %v915_v45 = vmax.f32 %v899_v38, 0.0 }
 0x284   :  { %v918_v44 = vmax.f32 %v902_v40, 0.0 }
 0x285   :  { %v916_v46 = vmax.f32 %v900_v42, 0.0 }
 0x286   :  { %v930_v47 = vpack.c.bf16 %v918_v44, %v917_v43 }
 0x287   :  { %v929_v48 = vpack.c.bf16 %v916_v46, %v915_v45  ;;  %v1494_v49 = vpop.f32.mrb[8].mxu1 }
 0x288   :  { %v905_v50 = vadd.f32 %v1494_v49, %v1306_v20  ;;  %v857_v51 = vpop.f32.mrb[9].mxu1 }
 0x289   :  { %v903_v52 = vadd.f32 %v1306_v20, %v857_v51  ;;  %v1495_v53 = vpop.f32.mrb[10].mxu1  ;;  %1520 = vmatprep.mubr.bf16.mxu0 %v929_v48 }
 0x28a   :  { %v906_v54 = vadd.f32 %v1495_v53, %v1306_v20  ;;  %v860_v55 = vpop.f32.mrb[11].mxu1  ;;  %1521 = vmatmul.mubr.bf16.gmra.mrb[36].mxu0 %v930_v47  ;;  %v921_v57 = vmax.f32 %v905_v50, 0.0 }
 0x28b   :  { %v904_v56 = vadd.f32 %v1306_v20, %v860_v55  ;;  %v919_v59 = vmax.f32 %v903_v52, 0.0 }
 0x28c   :  { %v922_v58 = vmax.f32 %v906_v54, 0.0 }
 0x28d   :  { %v920_v60 = vmax.f32 %v904_v56, 0.0 }
 0x28e   :  { %v932_v61 = vpack.c.bf16 %v922_v58, %v921_v57 }
 0x28f   :  { %v931_v62 = vpack.c.bf16 %v920_v60, %v919_v59  ;;  %v1498_v63 = vpop.f32.mrb[12].mxu1 }
 0x290   :  { %v909_v0 = vadd.f32 %v1498_v63, %v1306_v20  ;;  %v873_v1 = vpop.f32.mrb[13].mxu1 }
 0x291   :  { %v907_v2 = vadd.f32 %v1306_v20, %v873_v1  ;;  %v1499_v3 = vpop.f32.mrb[14].mxu1  ;;  %1524 = vmatprep.mubr.bf16.mxu1 %v931_v62 }
 0x292   :  { %v910_v4 = vadd.f32 %v1499_v3, %v1306_v20  ;;  %v876_v5 = vpop.f32.mrb[15].mxu1  ;;  %1525 = vmatmul.mubr.bf16.vlgmr.msra.gmra.mrb[16].mxu1 %v932_v61  ;;  %v925_v7 = vmax.f32 %v909_v0, 0.0 }
 0x293   :  { %v908_v6 = vadd.f32 %v1306_v20, %v876_v5  ;;  %v923_v9 = vmax.f32 %v907_v2, 0.0 }
 0x294   :  { %v926_v8 = vmax.f32 %v910_v4, 0.0 }
 0x295   :  { %v924_v10 = vmax.f32 %v908_v6, 0.0 }
 0x296   :  { %v934_v11 = vpack.c.bf16 %v926_v8, %v925_v7 }
 0x297   :  { %v933_v12 = vpack.c.bf16 %v924_v10, %v923_v9 }
 0x299   :  { %1528 = vmatprep.mubr.bf16.mxu1 %v933_v12 }
 0x29a   :  { %1529 = vmatmul.mubr.bf16.gmra.mrb[20].mxu1 %v934_v11 }
 0x355   :  { %v1518_v13 = vpop.f32.mrb[32].mxu0 }
 0x356   :  { %v1049_v15 = vpop.f32.mrb[33].mxu0  ;;  %v1172_v17 = vadd.f32 %v1518_v13, %v1315_v14 }
 0x357   :  { %v1519_v16 = vpop.f32.mrb[34].mxu0  ;;  %v1170_v19 = vadd.f32 %v1315_v14, %v1049_v15 }
 0x358   :  { %v1052_v18 = vpop.f32.mrb[35].mxu0  ;;  %1188 = vst [vmem:[#allocation4 + $0x10] sm:$0xff] %v1172_v17  ;;  %v1173_v20 = vadd.f32 %v1519_v16, %v1315_v14 }
 0x359   :  { %1186 = vst [vmem:[#allocation4] sm:$0xff] %v1170_v19  ;;  %v1171_v21 = vadd.f32 %v1315_v14, %v1052_v18 }
 0x35a   :  { %1189 = vst [vmem:[#allocation4 + $0x18] sm:$0xff] %v1173_v20 }
 0x35b   :  { %1187 = vst [vmem:[#allocation4 + $0x8] sm:$0xff] %v1171_v21 }
 0x35d   :  { %v1522_v22 = vpop.f32.mrb[36].mxu0 }
 0x35e   :  { %v1065_v23 = vpop.f32.mrb[37].mxu0  ;;  %v1176_v25 = vadd.f32 %v1522_v22, %v1315_v14 }
 0x35f   :  { %v1523_v24 = vpop.f32.mrb[38].mxu0  ;;  %v1174_v27 = vadd.f32 %v1315_v14, %v1065_v23 }
 0x360   :  { %v1068_v26 = vpop.f32.mrb[39].mxu0  ;;  %1192 = vst [vmem:[#allocation4 + $0x30] sm:$0xff] %v1176_v25  ;;  %v1177_v28 = vadd.f32 %v1523_v24, %v1315_v14 }
 0x361   :  { %1190 = vst [vmem:[#allocation4 + $0x20] sm:$0xff] %v1174_v27  ;;  %v1175_v29 = vadd.f32 %v1315_v14, %v1068_v26 }
 0x362   :  { %1193 = vst [vmem:[#allocation4 + $0x38] sm:$0xff] %v1177_v28 }
 0x363   :  { %1191 = vst [vmem:[#allocation4 + $0x28] sm:$0xff] %v1175_v29 }
 0x365   :  { %v1526_v30 = vpop.f32.mrb[16].mxu1 }
 0x366   :  { %v1081_v31 = vpop.f32.mrb[17].mxu1  ;;  %v1180_v33 = vadd.f32 %v1526_v30, %v1315_v14 }
 0x367   :  { %v1527_v32 = vpop.f32.mrb[18].mxu1  ;;  %v1178_v35 = vadd.f32 %v1315_v14, %v1081_v31 }
 0x368   :  { %v1084_v34 = vpop.f32.mrb[19].mxu1  ;;  %1196 = vst [vmem:[#allocation4 + $0x50] sm:$0xff] %v1180_v33  ;;  %v1181_v36 = vadd.f32 %v1527_v32, %v1315_v14 }
 0x369   :  { %1194 = vst [vmem:[#allocation4 + $0x40] sm:$0xff] %v1178_v35  ;;  %v1179_v37 = vadd.f32 %v1315_v14, %v1084_v34 }
 0x36a   :  { %1197 = vst [vmem:[#allocation4 + $0x58] sm:$0xff] %v1181_v36 }
 0x36b   :  { %1195 = vst [vmem:[#allocation4 + $0x48] sm:$0xff] %v1179_v37 }
 0x36d   :  { %v1530_v38 = vpop.f32.mrb[20].mxu1 }
 0x36e   :  { %v1097_v39 = vpop.f32.mrb[21].mxu1  ;;  %v1184_v41 = vadd.f32 %v1530_v38, %v1315_v14 }
 0x36f   :  { %v1531_v40 = vpop.f32.mrb[22].mxu1  ;;  %v1182_v43 = vadd.f32 %v1315_v14, %v1097_v39 }
 0x370   :  { %v1100_v42 = vpop.f32.mrb[23].mxu1  ;;  %1200 = vst [vmem:[#allocation4 + $0x70] sm:$0xff] %v1184_v41  ;;  %v1185_v44 = vadd.f32 %v1531_v40, %v1315_v14 }
 0x371   :  { %1198 = vst [vmem:[#allocation4 + $0x60] sm:$0xff] %v1182_v43  ;;  %v1183_v45 = vadd.f32 %v1315_v14, %v1100_v42 }
 0x372   :  { %1201 = vst [vmem:[#allocation4 + $0x78] sm:$0xff] %v1185_v44 }
 0x373   :  { %1199 = vst [vmem:[#allocation4 + $0x68] sm:$0xff] %v1183_v45 }
 0x374   :  { %1615 = shalt.err (!%p1612_p4)
}
 0x375   :  { %s1616_s16 = scalar_lea.hbm %s2054_s8, 2048 }
 0x376   :  { %p1617_p5 = scmp.ne.s32.totalorder %s2054_s8, %s1616_s16  ;;  %p1620_p6 = scmp.lt.u32.totalorder %s1616_s16, %s2054_s8 }
 0x378   :  { %p1622_p7 = pnand %p1620_p6, %p1617_p5 }
 0x37a   :  { %1625 = shalt.err (!%p1622_p7)
}
 0x37b   :  { %s1631_s21 = smov 128   ;;  %s1632_s22 = smov 8  }
 0x37c   :  { %1213 = dma.vmem_to_hbm [thread:$0]  %s1208_s13, 2048, %s2054_s8, [#allocation5], %s1631_s21, %s1631_s21, %s1632_s22  }
 0x37d   :  { %1626 = dma.done.wait [#allocation5], 2048  }
 0x37e   :  { %1627 = vsyncadd [#allocation5], 4294965248 }
 0x37f   :  { %1217 = vsyncpa [#allocation5], 1 }

// kernel: tpu_custom_call.1
= control target key start
LH: loop header
LB: loop body
LE: loop exit
PB: predicated region body
PF: predicated region fallthrough
CT: control target
= control target key end

     0   :  { %v1628_v2 = vmov 0   ;;  %s2046_s0 = inlined_call_operand.vmem [shape: s32[128,1], index: 0, kind: input, shape index: {}]   ;;  %s2047_s1 = inlined_call_operand.vmem [shape: s32[128,1], index: 1, kind: input, shape index: {}]   ;;  %s2048_s2 = inlined_call_operand.vmem [shape: bf16[128,128], index: 2, kind: input, shape index: {}]   ;;  %s2049_s3 = inlined_call_operand.vmem [shape: bf16[128,128], index: 3, kind: input, shape index: {}]   ;;  %s2050_s4 = inlined_call_operand.vmem [shape: bf16[128,128], index: 4, kind: input, shape index: {}]   ;;  %s2051_s5 = inlined_call_operand.vmem [shape: f32[1,128], index: 5, kind: input, shape index: {}]   ;;  %s2052_s6 = inlined_call_operand.vmem [shape: bf16[128,128], index: 6, kind: input, shape index: {}]   ;;  %s2053_s7 = inlined_call_operand.vmem [shape: f32[1,128], index: 7, kind: input, shape index: {}]   ;;  %s2054_s8 = inlined_call_operand.hbm [shape: f32[128,128], index: 8, kind: output, shape index: {}]  }
   0x1   :  { %v37_v0 = vld [vmem:[%s2046_s0 + $0x10] sm:$0xff]  ;;  %v35_v1 = vld [vmem:[%s2046_s0] sm:$0xff]  ;;  %1571 = vset.pattern.permute.xlu1 %v1628_v2  ;;  %1570 = vset.pattern.permute.xlu0 %v1628_v2  ;;  %v38_v3 = vld [vmem:[%s2046_s0 + $0x18] sm:$0xff] }
   0x2   :  { %76 = vperm.xlu1 %1571, %v37_v0   ;;  %70 = vperm.xlu0 %1570, %v35_v1   ;;  %v36_v4 = vld [vmem:[%s2046_s0 + $0x8] sm:$0xff]  ;;  %v39_v6 = vld [vmem:[%s2046_s0 + $0x20] sm:$0xff]  ;;  %v42_v7 = vld [vmem:[%s2046_s0 + $0x38] sm:$0xff] }
   0x3   :  { %v40_v5 = vld [vmem:[%s2046_s0 + $0x28] sm:$0xff]  ;;  %v41_v8 = vld [vmem:[%s2046_s0 + $0x30] sm:$0xff]  ;;  %v1572_v9 = vld [vmem:[%s2048_s2] sm:$0xff]  }
   0x4   :  { %v1573_v10 = vld [vmem:[%s2048_s2 + $0x8] sm:$0xff]   ;;  %1388 = vmatprep.subr.bf16.mxu0 %v1572_v9  ;;  %v43_v12 = vld [vmem:[%s2046_s0 + $0x40] sm:$0xff]  ;;  %v1574_v13 = vld [vmem:[%s2048_s2 + $0x10] sm:$0xff]  }
   0x5   :  { %v44_v11 = vld [vmem:[%s2046_s0 + $0x48] sm:$0xff]  ;;  %1389 = vmatpush3.bf16.msra.mxu0 %v1572_v9  ;;  %v46_v14 = vld [vmem:[%s2046_s0 + $0x58] sm:$0xff]  ;;  %v45_v15 = vld [vmem:[%s2046_s0 + $0x50] sm:$0xff] }
   0x6   :  { %79 = vperm.xlu1 %1571, %v38_v3   ;;  %73 = vperm.xlu0 %1570, %v36_v4   ;;  %v1575_v16 = vld [vmem:[%s2048_s2 + $0x18] sm:$0xff]   ;;  %v48_v17 = vld [vmem:[%s2046_s0 + $0x68] sm:$0xff]  ;;  %v47_v18 = vld [vmem:[%s2046_s0 + $0x60] sm:$0xff] }
   0x7   :  { %1390 = vmatprep.subr.bf16.mxu0 %v1573_v10  ;;  %v1576_v19 = vld [vmem:[%s2048_s2 + $0x20] sm:$0xff]   ;;  %v50_v20 = vld [vmem:[%s2046_s0 + $0x78] sm:$0xff]  ;;  %v49_v21 = vld [vmem:[%s2046_s0 + $0x70] sm:$0xff] }
   0x8   :  { %v1577_v22 = vld [vmem:[%s2048_s2 + $0x28] sm:$0xff]   ;;  %v51_v24 = vld [vmem:[%s2047_s1] sm:$0xff]  ;;  %v1578_v25 = vld [vmem:[%s2048_s2 + $0x30] sm:$0xff]  }
   0x9   :  { %1391 = vmatpush3.bf16.msra.mxu0 %v1573_v10  ;;  %v52_v23 = vld [vmem:[%s2047_s1 + $0x8] sm:$0xff] }
   0xa   :  { %85 = vperm.xlu1 %1571, %v40_v5   ;;  %82 = vperm.xlu0 %1570, %v39_v6  }
   0xb   :  { %1392 = vmatprep.subr.bf16.mxu0 %v1574_v13 }
   0xd   :  { %1393 = vmatpush3.bf16.msra.mxu0 %v1574_v13 }
   0xe   :  { %91 = vperm.xlu1 %1571, %v42_v7   ;;  %88 = vperm.xlu0 %1570, %v41_v8  }
   0xf   :  { %1394 = vmatprep.subr.bf16.mxu0 %v1575_v16 }
  0x11   :  { %1395 = vmatpush3.bf16.msra.mxu0 %v1575_v16 }
  0x12   :  { %97 = vperm.xlu1 %1571, %v44_v11   ;;  %94 = vperm.xlu0 %1570, %v43_v12  }
  0x13   :  { %1396 = vmatprep.subr.bf16.mxu0 %v1576_v19 }
  0x15   :  { %1397 = vmatpush3.bf16.msra.mxu0 %v1576_v19 }
  0x16   :  { %103 = vperm.xlu1 %1571, %v46_v14   ;;  %100 = vperm.xlu0 %1570, %v45_v15  }
  0x17   :  { %1398 = vmatprep.subr.bf16.mxu0 %v1577_v22 }
  0x1a   :  { %109 = vperm.xlu1 %1571, %v48_v17   ;;  %106 = vperm.xlu0 %1570, %v47_v18  }
  0x1e   :  { %115 = vperm.xlu1 %1571, %v50_v20   ;;  %112 = vperm.xlu0 %1570, %v49_v21  }
  0x22   :  { %121 = vperm.xlu1 %1571, %v52_v23   ;;  %118 = vperm.xlu0 %1570, %v51_v24  }
  0x23   :  { %13 = vsyncpa [#allocation5], 0  ;;  %v54_v26 = vld [vmem:[%s2047_s1 + $0x18] sm:$0xff]  ;;  %v53_v27 = vld [vmem:[%s2047_s1 + $0x10] sm:$0xff]  ;;  %1399 = vmatpush3.bf16.msra.mxu0 %v1577_v22  ;;  %v67_v41 = vlaneseq  ;;  %v1629_v47 = vmov 1.0|1.0  }
  0x24   :  { %1400 = vmatprep.subr.bf16.mxu0 %v1578_v25  ;;  %v1579_v28 = vld [vmem:[%s2048_s2 + $0x38] sm:$0xff]   ;;  %v56_v29 = vld [vmem:[%s2047_s1 + $0x28] sm:$0xff]  ;;  %v55_v30 = vld [vmem:[%s2047_s1 + $0x20] sm:$0xff] }
  0x25   :  { %v58_v31 = vld [vmem:[%s2047_s1 + $0x38] sm:$0xff]  ;;  %v57_v32 = vld [vmem:[%s2047_s1 + $0x30] sm:$0xff]  ;;  %v60_v33 = vld [vmem:[%s2047_s1 + $0x48] sm:$0xff]  ;;  %v1798_v44 = vand.u32 127, %v67_v41 }
  0x26   :  { %127 = vperm.xlu1 %1571, %v54_v26   ;;  %124 = vperm.xlu0 %1570, %v53_v27   ;;  %v59_v34 = vld [vmem:[%s2047_s1 + $0x40] sm:$0xff]  ;;  %v62_v35 = vld [vmem:[%s2047_s1 + $0x58] sm:$0xff]  ;;  %v61_v36 = vld [vmem:[%s2047_s1 + $0x50] sm:$0xff] }
  0x27   :  { %1401 = vmatpush3.bf16.msra.mxu0 %v1578_v25  ;;  %v64_v37 = vld [vmem:[%s2047_s1 + $0x68] sm:$0xff]  ;;  %v63_v38 = vld [vmem:[%s2047_s1 + $0x60] sm:$0xff]  ;;  %v66_v39 = vld [vmem:[%s2047_s1 + $0x78] sm:$0xff] }
  0x28   :  { %1402 = vmatprep.subr.bf16.mxu0 %v1579_v28  ;;  %v65_v40 = vld [vmem:[%s2047_s1 + $0x70] sm:$0xff]  ;;  %v1580_v12 = vld [vmem:[%s2050_s4] sm:$0xff]   ;;  %v1581_v13 = vld [vmem:[%s2050_s4 + $0x8] sm:$0xff]  }
  0x29   :  { %1436 = vmatprep.subr.bf16.mxu1 %v1580_v12  ;;  %v1582_v14 = vld [vmem:[%s2050_s4 + $0x10] sm:$0xff]   ;;  %v1583_v15 = vld [vmem:[%s2050_s4 + $0x18] sm:$0xff]   ;;  %v1584_v16 = vld [vmem:[%s2050_s4 + $0x20] sm:$0xff]  }
  0x2a   :  { %133 = vperm.xlu1 %1571, %v56_v29   ;;  %130 = vperm.xlu0 %1570, %v55_v30   ;;  %v1585_v17 = vld [vmem:[%s2050_s4 + $0x28] sm:$0xff]   ;;  %v1586_v18 = vld [vmem:[%s2050_s4 + $0x30] sm:$0xff]   ;;  %v1587_v19 = vld [vmem:[%s2050_s4 + $0x38] sm:$0xff]  }
  0x2b   :  { %1403 = vmatpush3.bf16.msra.mxu0 %v1579_v28  ;;  %1437 = vmatpush3.bf16.msra.mxu1 %v1580_v12  ;;  %v1588_v20 = vld [vmem:[%s2049_s3] sm:$0xff]   ;;  %v1883_v22 = vld [vmem:[%s2052_s6 + $0x8] sm:$0xff]   ;;  %v1891_v23 = vld [vmem:[%s2052_s6 + $0x10] sm:$0xff]  }
  0x2c   :  { %1438 = vmatprep.subr.bf16.mxu1 %v1581_v13  ;;  %v1878_v21 = vld [vmem:[%s2052_s6] sm:$0xff]   ;;  %v1898_v24 = vld [vmem:[%s2052_s6 + $0x18] sm:$0xff]   ;;  %v1912_v26 = vld [vmem:[%s2052_s6 + $0x28] sm:$0xff]  }
  0x2d   :  { %1500 = vmatprep.subr.bf16.mxu0 %v1878_v21  ;;  %v1905_v25 = vld [vmem:[%s2052_s6 + $0x20] sm:$0xff]   ;;  %v1594_v12 = vld [vmem:[%s2049_s3 + $0x30] sm:$0xff]  }
  0x2e   :  { %139 = vperm.xlu1 %1571, %v58_v31   ;;  %136 = vperm.xlu0 %1570, %v57_v32  }
  0x2f   :  { %1439 = vmatpush3.bf16.msra.mxu1 %v1581_v13 }
  0x30   :  { %1440 = vmatprep.subr.bf16.mxu1 %v1582_v14 }
  0x32   :  { %145 = vperm.xlu1 %1571, %v60_v33   ;;  %142 = vperm.xlu0 %1570, %v59_v34  }
  0x33   :  { %1441 = vmatpush3.bf16.msra.mxu1 %v1582_v14 }
  0x34   :  { %1442 = vmatprep.subr.bf16.mxu1 %v1583_v15 }
  0x36   :  { %151 = vperm.xlu1 %1571, %v62_v35   ;;  %148 = vperm.xlu0 %1570, %v61_v36  }
  0x37   :  { %1443 = vmatpush3.bf16.msra.mxu1 %v1583_v15 }
  0x38   :  { %1444 = vmatprep.subr.bf16.mxu1 %v1584_v16 }
  0x3a   :  { %157 = vperm.xlu1 %1571, %v64_v37   ;;  %154 = vperm.xlu0 %1570, %v63_v38  }
  0x3b   :  { %1445 = vmatpush3.bf16.msra.mxu1 %v1584_v16 }
  0x3c   :  { %1446 = vmatprep.subr.bf16.mxu1 %v1585_v17 }
  0x3e   :  { %163 = vperm.xlu1 %1571, %v66_v39   ;;  %160 = vperm.xlu0 %1570, %v65_v40  }
  0x3f   :  { %1447 = vmatpush3.bf16.msra.mxu1 %v1585_v17  ;;  %v1595_v17 = vld [vmem:[%s2049_s3 + $0x38] sm:$0xff]  }
  0x40   :  { %1448 = vmatprep.subr.bf16.mxu1 %v1586_v18 }
  0x43   :  { %1449 = vmatpush3.bf16.msra.mxu1 %v1586_v18  ;;  %v1602_v18 = vld [vmem:[%s2052_s6 + $0x30] sm:$0xff]  }
  0x44   :  { %1450 = vmatprep.subr.bf16.mxu1 %v1587_v19 }
  0x47   :  { %1451 = vmatpush3.bf16.msra.mxu1 %v1587_v19  ;;  %v1603_v19 = vld [vmem:[%s2052_s6 + $0x38] sm:$0xff]  }
  0x48   :  { %1468 = vmatprep.subr.bf16.mxu1 %v1588_v20 }
  0x81   :  { %v77_v42 = vpop.permute.xlu1 %76  ;;  %v71_v43 = vpop.permute.xlu0 %70 }
  0x82   :  { %vm167_vm0 = vcmp.eq.s32.totalorder %v1798_v44, %v77_v42  ;;  %vm165_vm3 = vcmp.eq.s32.totalorder %v1798_v44, %v71_v43 }
  0x85   :  { %v80_v45 = vpop.permute.xlu1 %79  ;;  %v74_v46 = vpop.permute.xlu0 %73 }
  0x86   :  { %vm168_vm1 = vcmp.eq.s32.totalorder %v1798_v44, %v80_v45  ;;  %vm166_vm2 = vcmp.eq.s32.totalorder %v1798_v44, %v74_v46 }
  0x87   :  { %vm1260_vm4 = vmpackc.low %vm168_vm1, %vm167_vm0 }
  0x88   :  { %vm1258_vm5 = vmpackc.low %vm166_vm2, %vm165_vm3 }
  0x89   :  { %1404 = vmatprep.mubr.msk.bf16.mxu0 %vm1258_vm5, %v1629_v47  ;;  %v86_v48 = vpop.permute.xlu1 %85  ;;  %v83_v49 = vpop.permute.xlu0 %82 }
  0x8a   :  { %vm170_vm6 = vcmp.eq.s32.totalorder %v1798_v44, %v86_v48  ;;  %1405 = vmatmul.mubr.msk.bf16.vlgmr.msra.gmra.mrb[0].mxu0 %vm1260_vm4, %v1629_v47  ;;  %vm169_vm7 = vcmp.eq.s32.totalorder %v1798_v44, %v83_v49 }
  0x8b   :  { %vm1262_vm8 = vmpackc.low %vm170_vm6, %vm169_vm7  ;;  %1501 = vmatpush3.bf16.msra.mxu0 %v1878_v21 }
  0x8c   :  { %1408 = vmatprep.mubr.msk.bf16.mxu0 %vm1262_vm8, %v1629_v47  ;;  %1502 = vmatprep.subr.bf16.mxu0 %v1883_v22 }
  0x8d   :  { %v92_v50 = vpop.permute.xlu1 %91  ;;  %v89_v51 = vpop.permute.xlu0 %88 }
  0x8e   :  { %vm172_vm9 = vcmp.eq.s32.totalorder %v1798_v44, %v92_v50  ;;  %vm171_vm10 = vcmp.eq.s32.totalorder %v1798_v44, %v89_v51 }
  0x8f   :  { %vm1264_vm11 = vmpackc.low %vm172_vm9, %vm171_vm10  ;;  %1503 = vmatpush3.bf16.msra.mxu0 %v1883_v22 }
  0x90   :  { %1504 = vmatprep.subr.bf16.mxu0 %v1891_v23 }
  0x91   :  { %v98_v52 = vpop.permute.xlu1 %97  ;;  %v95_v53 = vpop.permute.xlu0 %94 }
  0x92   :  { %vm174_vm12 = vcmp.eq.s32.totalorder %v1798_v44, %v98_v52  ;;  %1409 = vmatmul.mubr.msk.bf16.gmra.mrb[4].mxu0 %vm1264_vm11, %v1629_v47  ;;  %vm173_vm13 = vcmp.eq.s32.totalorder %v1798_v44, %v95_v53 }
  0x93   :  { %vm1266_vm14 = vmpackc.low %vm174_vm12, %vm173_vm13  ;;  %1505 = vmatpush3.bf16.msra.mxu0 %v1891_v23 }
  0x94   :  { %1412 = vmatprep.mubr.msk.bf16.mxu0 %vm1266_vm14, %v1629_v47  ;;  %1506 = vmatprep.subr.bf16.mxu0 %v1898_v24 }
  0x95   :  { %v104_v54 = vpop.permute.xlu1 %103  ;;  %v101_v55 = vpop.permute.xlu0 %100 }
  0x96   :  { %vm176_vm15 = vcmp.eq.s32.totalorder %v1798_v44, %v104_v54  ;;  %vm175_vm0 = vcmp.eq.s32.totalorder %v1798_v44, %v101_v55 }
  0x97   :  { %vm1268_vm1 = vmpackc.low %vm176_vm15, %vm175_vm0  ;;  %1507 = vmatpush3.bf16.msra.mxu0 %v1898_v24 }
  0x98   :  { %1508 = vmatprep.subr.bf16.mxu0 %v1905_v25 }
  0x99   :  { %v110_v56 = vpop.permute.xlu1 %109  ;;  %v107_v57 = vpop.permute.xlu0 %106 }
  0x9a   :  { %vm178_vm2 = vcmp.eq.s32.totalorder %v1798_v44, %v110_v56  ;;  %1413 = vmatmul.mubr.msk.bf16.gmra.mrb[8].mxu0 %vm1268_vm1, %v1629_v47  ;;  %vm177_vm3 = vcmp.eq.s32.totalorder %v1798_v44, %v107_v57  ;;  %v1589_v57 = vld [vmem:[%s2049_s3 + $0x8] sm:$0xff]  }
  0x9b   :  { %vm1270_vm4 = vmpackc.low %vm178_vm2, %vm177_vm3  ;;  %1509 = vmatpush3.bf16.msra.mxu0 %v1905_v25 }
  0x9c   :  { %1416 = vmatprep.mubr.msk.bf16.mxu0 %vm1270_vm4, %v1629_v47  ;;  %1510 = vmatprep.subr.bf16.mxu0 %v1912_v26 }
  0x9d   :  { %v116_v58 = vpop.permute.xlu1 %115  ;;  %v113_v59 = vpop.permute.xlu0 %112 }
  0x9e   :  { %vm180_vm5 = vcmp.eq.s32.totalorder %v1798_v44, %v116_v58  ;;  %vm179_vm6 = vcmp.eq.s32.totalorder %v1798_v44, %v113_v59 }
  0x9f   :  { %vm1272_vm7 = vmpackc.low %vm180_vm5, %vm179_vm6  ;;  %1511 = vmatpush3.bf16.msra.mxu0 %v1912_v26 }
  0xa0   :  { %1512 = vmatprep.subr.bf16.mxu0 %v1602_v18 }
  0xa1   :  { %v122_v60 = vpop.permute.xlu1 %121  ;;  %v119_v61 = vpop.permute.xlu0 %118 }
  0xa2   :  { %vm182_vm8 = vcmp.eq.s32.totalorder %v1798_v44, %v122_v60  ;;  %1417 = vmatmul.mubr.msk.bf16.gmra.mrb[12].mxu0 %vm1272_vm7, %v1629_v47  ;;  %vm181_vm9 = vcmp.eq.s32.totalorder %v1798_v44, %v119_v61  ;;  %v1590_v60 = vld [vmem:[%s2049_s3 + $0x10] sm:$0xff]  }
  0xa3   :  { %vm1274_vm10 = vmpackc.low %vm182_vm8, %vm181_vm9  ;;  %1513 = vmatpush3.bf16.msra.mxu0 %v1602_v18 }
  0xa4   :  { %1420 = vmatprep.mubr.msk.bf16.mxu0 %vm1274_vm10, %v1629_v47  ;;  %1514 = vmatprep.subr.bf16.mxu0 %v1603_v19 }
  0xa5   :  { %v128_v62 = vpop.permute.xlu1 %127  ;;  %v125_v63 = vpop.permute.xlu0 %124 }
  0xa6   :  { %vm184_vm11 = vcmp.eq.s32.totalorder %v1798_v44, %v128_v62  ;;  %vm183_vm12 = vcmp.eq.s32.totalorder %v1798_v44, %v125_v63 }
  0xa7   :  { %vm1276_vm13 = vmpackc.low %vm184_vm11, %vm183_vm12  ;;  %1515 = vmatpush3.bf16.msra.mxu0 %v1603_v19 }
  0xa9   :  { %v134_v0 = vpop.permute.xlu1 %133  ;;  %v131_v1 = vpop.permute.xlu0 %130 }
  0xaa   :  { %vm186_vm14 = vcmp.eq.s32.totalorder %v1798_v44, %v134_v0  ;;  %1421 = vmatmul.mubr.msk.bf16.gmra.mrb[16].mxu0 %vm1276_vm13, %v1629_v47  ;;  %vm185_vm15 = vcmp.eq.s32.totalorder %v1798_v44, %v131_v1  ;;  %v1591_v1 = vld [vmem:[%s2049_s3 + $0x18] sm:$0xff]  }
  0xab   :  { %vm1278_vm0 = vmpackc.low %vm186_vm14, %vm185_vm15 }
  0xac   :  { %1424 = vmatprep.mubr.msk.bf16.mxu0 %vm1278_vm0, %v1629_v47 }
  0xad   :  { %v140_v2 = vpop.permute.xlu1 %139  ;;  %v137_v3 = vpop.permute.xlu0 %136 }
  0xae   :  { %vm188_vm1 = vcmp.eq.s32.totalorder %v1798_v44, %v140_v2  ;;  %vm187_vm2 = vcmp.eq.s32.totalorder %v1798_v44, %v137_v3 }
  0xaf   :  { %vm1280_vm3 = vmpackc.low %vm188_vm1, %vm187_vm2 }
  0xb1   :  { %v146_v4 = vpop.permute.xlu1 %145  ;;  %v143_v5 = vpop.permute.xlu0 %142 }
  0xb2   :  { %vm190_vm4 = vcmp.eq.s32.totalorder %v1798_v44, %v146_v4  ;;  %1425 = vmatmul.mubr.msk.bf16.gmra.mrb[20].mxu0 %vm1280_vm3, %v1629_v47  ;;  %vm189_vm5 = vcmp.eq.s32.totalorder %v1798_v44, %v143_v5  ;;  %v1592_v4 = vld [vmem:[%s2049_s3 + $0x20] sm:$0xff]  }
  0xb3   :  { %vm1282_vm6 = vmpackc.low %vm190_vm4, %vm189_vm5 }
  0xb4   :  { %1428 = vmatprep.mubr.msk.bf16.mxu0 %vm1282_vm6, %v1629_v47 }
  0xb5   :  { %v152_v6 = vpop.permute.xlu1 %151  ;;  %v149_v7 = vpop.permute.xlu0 %148 }
  0xb6   :  { %vm192_vm7 = vcmp.eq.s32.totalorder %v1798_v44, %v152_v6  ;;  %vm191_vm8 = vcmp.eq.s32.totalorder %v1798_v44, %v149_v7 }
  0xb7   :  { %vm1284_vm9 = vmpackc.low %vm192_vm7, %vm191_vm8 }
  0xb9   :  { %v158_v8 = vpop.permute.xlu1 %157  ;;  %v155_v9 = vpop.permute.xlu0 %154 }
  0xba   :  { %vm194_vm10 = vcmp.eq.s32.totalorder %v1798_v44, %v158_v8  ;;  %1429 = vmatmul.mubr.msk.bf16.gmra.mrb[24].mxu0 %vm1284_vm9, %v1629_v47  ;;  %vm193_vm11 = vcmp.eq.s32.totalorder %v1798_v44, %v155_v9  ;;  %v1593_v9 = vld [vmem:[%s2049_s3 + $0x28] sm:$0xff]  }
  0xbb   :  { %vm1286_vm12 = vmpackc.low %vm194_vm10, %vm193_vm11 }
  0xbc   :  { %1432 = vmatprep.mubr.msk.bf16.mxu0 %vm1286_vm12, %v1629_v47 }
  0xbd   :  { %v164_v10 = vpop.permute.xlu1 %163  ;;  %v161_v11 = vpop.permute.xlu0 %160 }
  0xbe   :  { %vm196_vm13 = vcmp.eq.s32.totalorder %v1798_v44, %v164_v10  ;;  %vm195_vm14 = vcmp.eq.s32.totalorder %v1798_v44, %v161_v11 }
  0xbf   :  { %vm1288_vm15 = vmpackc.low %vm196_vm13, %vm195_vm14 }
  0xc2   :  { %1433 = vmatmul.mubr.msk.bf16.gmra.mrb[28].mxu0 %vm1288_vm15, %v1629_v47 }
 0x15d   :  { %v1917_v27 = vpop.f32.mrb[0].mxu0 }
 0x15e   :  { %v1919_v28 = vpop.f32.mrb[1].mxu0 }
 0x15f   :  { %v1921_v29 = vpop.f32.mrb[2].mxu0 }
 0x160   :  { %v503_v30 = vpack.c.bf16 %v1921_v29, %v1917_v27  ;;  %v1925_v31 = vpop.f32.mrb[3].mxu0 }
 0x161   :  { %v502_v32 = vpack.c.bf16 %v1925_v31, %v1919_v28 }
 0x165   :  { %v1929_v33 = vpop.f32.mrb[4].mxu0 }
 0x166   :  { %v1931_v34 = vpop.f32.mrb[5].mxu0 }
 0x167   :  { %v1933_v35 = vpop.f32.mrb[6].mxu0 }
 0x168   :  { %v505_v36 = vpack.c.bf16 %v1933_v35, %v1929_v33  ;;  %v1937_v37 = vpop.f32.mrb[7].mxu0 }
 0x169   :  { %v504_v38 = vpack.c.bf16 %v1937_v37, %v1931_v34 }
 0x16d   :  { %v1941_v39 = vpop.f32.mrb[8].mxu0 }
 0x16e   :  { %v1943_v40 = vpop.f32.mrb[9].mxu0 }
 0x16f   :  { %v1945_v41 = vpop.f32.mrb[10].mxu0 }
 0x170   :  { %v507_v42 = vpack.c.bf16 %v1945_v41, %v1941_v39  ;;  %v1949_v43 = vpop.f32.mrb[11].mxu0 }
 0x171   :  { %v506_v44 = vpack.c.bf16 %v1949_v43, %v1943_v40 }
 0x175   :  { %v1953_v45 = vpop.f32.mrb[12].mxu0 }
 0x176   :  { %v1955_v46 = vpop.f32.mrb[13].mxu0 }
 0x177   :  { %v1957_v47 = vpop.f32.mrb[14].mxu0 }
 0x178   :  { %v509_v48 = vpack.c.bf16 %v1957_v47, %v1953_v45  ;;  %v1961_v49 = vpop.f32.mrb[15].mxu0 }
 0x179   :  { %v508_v50 = vpack.c.bf16 %v1961_v49, %v1955_v46 }
 0x17d   :  { %v1422_v51 = vpop.f32.mrb[16].mxu0 }
 0x17e   :  { %v439_v52 = vpop.f32.mrb[17].mxu0 }
 0x17f   :  { %v1423_v53 = vpop.f32.mrb[18].mxu0 }
 0x180   :  { %v519_v54 = vpack.c.bf16 %v1423_v53, %v1422_v51  ;;  %v442_v55 = vpop.f32.mrb[19].mxu0 }
 0x181   :  { %v518_v56 = vpack.c.bf16 %v442_v55, %v439_v52 }
 0x183   :  { %1452 = vmatprep.mubr.bf16.mxu1 %v518_v56 }
 0x184   :  { %1453 = vmatmul.mubr.bf16.vlgmr.msra.gmra.mrb[0].mxu1 %v519_v54 }
 0x185   :  { %1469 = vmatpush3.bf16.msra.mxu1 %v1588_v20  ;;  %v1426_v58 = vpop.f32.mrb[20].mxu0  ;;  %v1306_v20 = vld [vmem:[%s2051_s5] ss:$0 sm:$0xff] }
 0x186   :  { %v455_v59 = vpop.f32.mrb[21].mxu0  ;;  %1470 = vmatprep.subr.bf16.mxu1 %v1589_v57 }
 0x187   :  { %v1427_v61 = vpop.f32.mrb[22].mxu0 }
 0x188   :  { %v521_v62 = vpack.c.bf16 %v1427_v61, %v1426_v58  ;;  %v458_v63 = vpop.f32.mrb[23].mxu0 }
 0x189   :  { %v520_v0 = vpack.c.bf16 %v458_v63, %v455_v59  ;;  %1471 = vmatpush3.bf16.msra.mxu1 %v1589_v57 }
 0x18a   :  { %1472 = vmatprep.subr.bf16.mxu1 %v1590_v60 }
 0x18b   :  { %1456 = vmatprep.mubr.bf16.mxu1 %v520_v0 }
 0x18c   :  { %1457 = vmatmul.mubr.bf16.gmra.mrb[4].mxu1 %v521_v62 }
 0x18d   :  { %1473 = vmatpush3.bf16.msra.mxu1 %v1590_v60  ;;  %v1430_v2 = vpop.f32.mrb[24].mxu0 }
 0x18e   :  { %v471_v3 = vpop.f32.mrb[25].mxu0  ;;  %1474 = vmatprep.subr.bf16.mxu1 %v1591_v1 }
 0x18f   :  { %v1431_v5 = vpop.f32.mrb[26].mxu0 }
 0x190   :  { %v523_v6 = vpack.c.bf16 %v1431_v5, %v1430_v2  ;;  %v474_v7 = vpop.f32.mrb[27].mxu0 }
 0x191   :  { %v522_v8 = vpack.c.bf16 %v474_v7, %v471_v3  ;;  %1475 = vmatpush3.bf16.msra.mxu1 %v1591_v1 }
 0x192   :  { %1476 = vmatprep.subr.bf16.mxu1 %v1592_v4 }
 0x193   :  { %1460 = vmatprep.mubr.bf16.mxu1 %v522_v8 }
 0x194   :  { %1461 = vmatmul.mubr.bf16.gmra.mrb[8].mxu1 %v523_v6 }
 0x195   :  { %1477 = vmatpush3.bf16.msra.mxu1 %v1592_v4  ;;  %v1434_v10 = vpop.f32.mrb[28].mxu0 }
 0x196   :  { %v487_v11 = vpop.f32.mrb[29].mxu0  ;;  %1478 = vmatprep.subr.bf16.mxu1 %v1593_v9 }
 0x197   :  { %v1435_v13 = vpop.f32.mrb[30].mxu0 }
 0x198   :  { %v525_v14 = vpack.c.bf16 %v1435_v13, %v1434_v10  ;;  %v490_v15 = vpop.f32.mrb[31].mxu0 }
 0x199   :  { %v524_v16 = vpack.c.bf16 %v490_v15, %v487_v11  ;;  %1479 = vmatpush3.bf16.msra.mxu1 %v1593_v9 }
 0x19a   :  { %1480 = vmatprep.subr.bf16.mxu1 %v1594_v12 }
 0x19b   :  { %1464 = vmatprep.mubr.bf16.mxu1 %v524_v16 }
 0x19c   :  { %1465 = vmatmul.mubr.bf16.gmra.mrb[12].mxu1 %v525_v14  ;;  %v1315_v14 = vld [vmem:[%s2053_s7] ss:$0 sm:$0xff]  ;;  %s1630_s7 = smov [#allocation4]  }
 0x19d   :  { %1481 = vmatpush3.bf16.msra.mxu1 %v1594_v12  ;;  %1484 = vmatprep.mubr.bf16.mxu1 %v502_v32  ;;  %s1207_s13 = sshll.u32 %s1630_s7, 4  ;;  %s1208_s13 = int_to_ptr.vmem [resolvable:$true] %s1207_s13 }
 0x19e   :  { %1482 = vmatprep.subr.bf16.mxu1 %v1595_v17  ;;  %s1604_s14 = scalar_lea.vmem %s1208_s13, 2048  ;;  %p1609_p1 = scmp.lt.s32.totalorder %s1208_s13, %s1208_s13 }
 0x19f   :  { %p1605_p0 = scmp.ne.s32.totalorder %s1208_s13, %s1604_s14  ;;  %p1610_p2 = scmp.lt.s32.totalorder %s1604_s14, %s1604_s14 }
 0x1a1   :  { %1483 = vmatpush3.bf16.msra.mxu1 %v1595_v17  ;;  %p1611_p3 = por %p1610_p2, %p1609_p1 }
 0x1a2   :  { %1532 = vmatprep.subr.bf16.mxu1 %v1878_v21 }
 0x1a3   :  { %p1612_p4 = pnand %p1611_p3, %p1605_p0 }
 0x1a4   :  { %1485 = vmatmul.mubr.bf16.vlgmr.msra.gmra.mrb[0].mxu1 %v503_v30 }
 0x1a5   :  { %1488 = vmatprep.mubr.bf16.mxu1 %v504_v38  ;;  %1540 = vmatpush3.bf16.msra.mxu1 %v1878_v21 }
 0x1a6   :  { %1533 = vmatprep.subr.bf16.mxu1 %v1883_v22 }
 0x1a9   :  { %1541 = vmatpush3.bf16.msra.mxu1 %v1883_v22 }
 0x1aa   :  { %1534 = vmatprep.subr.bf16.mxu1 %v1891_v23 }
 0x1ac   :  { %1489 = vmatmul.mubr.bf16.gmra.mrb[4].mxu1 %v505_v36 }
 0x1ad   :  { %1492 = vmatprep.mubr.bf16.mxu1 %v506_v44  ;;  %1542 = vmatpush3.bf16.msra.mxu1 %v1891_v23 }
 0x1ae   :  { %1535 = vmatprep.subr.bf16.mxu1 %v1898_v24 }
 0x1b1   :  { %1543 = vmatpush3.bf16.msra.mxu1 %v1898_v24 }
 0x1b2   :  { %1536 = vmatprep.subr.bf16.mxu1 %v1905_v25 }
 0x1b4   :  { %1493 = vmatmul.mubr.bf16.gmra.mrb[8].mxu1 %v507_v42 }
 0x1b5   :  { %1496 = vmatprep.mubr.bf16.mxu1 %v508_v50  ;;  %1544 = vmatpush3.bf16.msra.mxu1 %v1905_v25 }
 0x1b6   :  { %1537 = vmatprep.subr.bf16.mxu1 %v1912_v26 }
 0x1b9   :  { %1545 = vmatpush3.bf16.msra.mxu1 %v1912_v26 }
 0x1ba   :  { %1538 = vmatprep.subr.bf16.mxu1 %v1602_v18 }
 0x1bc   :  { %1497 = vmatmul.mubr.bf16.gmra.mrb[12].mxu1 %v509_v48 }
 0x1bd   :  { %1546 = vmatpush3.bf16.msra.mxu1 %v1602_v18 }
 0x1be   :  { %1539 = vmatprep.subr.bf16.mxu1 %v1603_v19 }
 0x1c1   :  { %1547 = vmatpush3.bf16.msra.mxu1 %v1603_v19 }
 0x277   :  { %v1486_v21 = vpop.f32.mrb[0].mxu1 }
 0x278   :  { %v897_v22 = vadd.f32 %v1486_v21, %v1306_v20  ;;  %v825_v23 = vpop.f32.mrb[1].mxu1 }
 0x279   :  { %v895_v24 = vadd.f32 %v1306_v20, %v825_v23  ;;  %v1487_v25 = vpop.f32.mrb[2].mxu1 }
 0x27a   :  { %v898_v26 = vadd.f32 %v1487_v25, %v1306_v20  ;;  %v828_v27 = vpop.f32.mrb[3].mxu1  ;;  %v913_v29 = vmax.f32 %v897_v22, 0.0 }
 0x27b   :  { %v896_v28 = vadd.f32 %v1306_v20, %v828_v27  ;;  %v911_v31 = vmax.f32 %v895_v24, 0.0 }
 0x27c   :  { %v914_v30 = vmax.f32 %v898_v26, 0.0 }
 0x27d   :  { %v912_v32 = vmax.f32 %v896_v28, 0.0 }
 0x27e   :  { %v928_v33 = vpack.c.bf16 %v914_v30, %v913_v29 }
 0x27f   :  { %v927_v34 = vpack.c.bf16 %v912_v32, %v911_v31  ;;  %v1490_v35 = vpop.f32.mrb[4].mxu1 }
 0x280   :  { %v901_v36 = vadd.f32 %v1490_v35, %v1306_v20  ;;  %v841_v37 = vpop.f32.mrb[5].mxu1 }
 0x281   :  { %v899_v38 = vadd.f32 %v1306_v20, %v841_v37  ;;  %v1491_v39 = vpop.f32.mrb[6].mxu1  ;;  %1516 = vmatprep.mubr.bf16.mxu0 %v927_v34 }
 0x282   :  { %v902_v40 = vadd.f32 %v1491_v39, %v1306_v20  ;;  %v844_v41 = vpop.f32.mrb[7].mxu1  ;;  %1517 = vmatmul.mubr.bf16.vlgmr.msra.gmra.mrb[32].mxu0 %v928_v33  ;;  %v917_v43 = vmax.f32 %v901_v36, 0.0 }
 0x283   :  { %v900_v42 = vadd.f32 %v1306_v20, %v844_v41  ;;  %v915_v45 = vmax.f32 %v899_v38, 0.0 }
 0x284   :  { %v918_v44 = vmax.f32 %v902_v40, 0.0 }
 0x285   :  { %v916_v46 = vmax.f32 %v900_v42, 0.0 }
 0x286   :  { %v930_v47 = vpack.c.bf16 %v918_v44, %v917_v43 }
 0x287   :  { %v929_v48 = vpack.c.bf16 %v916_v46, %v915_v45  ;;  %v1494_v49 = vpop.f32.mrb[8].mxu1 }
 0x288   :  { %v905_v50 = vadd.f32 %v1494_v49, %v1306_v20  ;;  %v857_v51 = vpop.f32.mrb[9].mxu1 }
 0x289   :  { %v903_v52 = vadd.f32 %v1306_v20, %v857_v51  ;;  %v1495_v53 = vpop.f32.mrb[10].mxu1  ;;  %1520 = vmatprep.mubr.bf16.mxu0 %v929_v48 }
 0x28a   :  { %v906_v54 = vadd.f32 %v1495_v53, %v1306_v20  ;;  %v860_v55 = vpop.f32.mrb[11].mxu1  ;;  %1521 = vmatmul.mubr.bf16.gmra.mrb[36].mxu0 %v930_v47  ;;  %v921_v57 = vmax.f32 %v905_v50, 0.0 }
 0x28b   :  { %v904_v56 = vadd.f32 %v1306_v20, %v860_v55  ;;  %v919_v59 = vmax.f32 %v903_v52, 0.0 }
 0x28c   :  { %v922_v58 = vmax.f32 %v906_v54, 0.0 }
 0x28d   :  { %v920_v60 = vmax.f32 %v904_v56, 0.0 }
 0x28e   :  { %v932_v61 = vpack.c.bf16 %v922_v58, %v921_v57 }
 0x28f   :  { %v931_v62 = vpack.c.bf16 %v920_v60, %v919_v59  ;;  %v1498_v63 = vpop.f32.mrb[12].mxu1 }
 0x290   :  { %v909_v0 = vadd.f32 %v1498_v63, %v1306_v20  ;;  %v873_v1 = vpop.f32.mrb[13].mxu1 }
 0x291   :  { %v907_v2 = vadd.f32 %v1306_v20, %v873_v1  ;;  %v1499_v3 = vpop.f32.mrb[14].mxu1  ;;  %1524 = vmatprep.mubr.bf16.mxu1 %v931_v62 }
 0x292   :  { %v910_v4 = vadd.f32 %v1499_v3, %v1306_v20  ;;  %v876_v5 = vpop.f32.mrb[15].mxu1  ;;  %1525 = vmatmul.mubr.bf16.vlgmr.msra.gmra.mrb[16].mxu1 %v932_v61  ;;  %v925_v7 = vmax.f32 %v909_v0, 0.0 }
 0x293   :  { %v908_v6 = vadd.f32 %v1306_v20, %v876_v5  ;;  %v923_v9 = vmax.f32 %v907_v2, 0.0 }
 0x294   :  { %v926_v8 = vmax.f32 %v910_v4, 0.0 }
 0x295   :  { %v924_v10 = vmax.f32 %v908_v6, 0.0 }
 0x296   :  { %v934_v11 = vpack.c.bf16 %v926_v8, %v925_v7 }
 0x297   :  { %v933_v12 = vpack.c.bf16 %v924_v10, %v923_v9 }
 0x299   :  { %1528 = vmatprep.mubr.bf16.mxu1 %v933_v12 }
 0x29a   :  { %1529 = vmatmul.mubr.bf16.gmra.mrb[20].mxu1 %v934_v11 }
 0x355   :  { %v1518_v13 = vpop.f32.mrb[32].mxu0 }
 0x356   :  { %v1049_v15 = vpop.f32.mrb[33].mxu0  ;;  %v1172_v17 = vadd.f32 %v1518_v13, %v1315_v14 }
 0x357   :  { %v1519_v16 = vpop.f32.mrb[34].mxu0  ;;  %v1170_v19 = vadd.f32 %v1315_v14, %v1049_v15 }
 0x358   :  { %v1052_v18 = vpop.f32.mrb[35].mxu0  ;;  %1188 = vst [vmem:[#allocation4 + $0x10] sm:$0xff] %v1172_v17  ;;  %v1173_v20 = vadd.f32 %v1519_v16, %v1315_v14 }
 0x359   :  { %1186 = vst [vmem:[#allocation4] sm:$0xff] %v1170_v19  ;;  %v1171_v21 = vadd.f32 %v1315_v14, %v1052_v18 }
 0x35a   :  { %1189 = vst [vmem:[#allocation4 + $0x18] sm:$0xff] %v1173_v20 }
 0x35b   :  { %1187 = vst [vmem:[#allocation4 + $0x8] sm:$0xff] %v1171_v21 }
 0x35d   :  { %v1522_v22 = vpop.f32.mrb[36].mxu0 }
 0x35e   :  { %v1065_v23 = vpop.f32.mrb[37].mxu0  ;;  %v1176_v25 = vadd.f32 %v1522_v22, %v1315_v14 }
 0x35f   :  { %v1523_v24 = vpop.f32.mrb[38].mxu0  ;;  %v1174_v27 = vadd.f32 %v1315_v14, %v1065_v23 }
 0x360   :  { %v1068_v26 = vpop.f32.mrb[39].mxu0  ;;  %1192 = vst [vmem:[#allocation4 + $0x30] sm:$0xff] %v1176_v25  ;;  %v1177_v28 = vadd.f32 %v1523_v24, %v1315_v14 }
 0x361   :  { %1190 = vst [vmem:[#allocation4 + $0x20] sm:$0xff] %v1174_v27  ;;  %v1175_v29 = vadd.f32 %v1315_v14, %v1068_v26 }
 0x362   :  { %1193 = vst [vmem:[#allocation4 + $0x38] sm:$0xff] %v1177_v28 }
 0x363   :  { %1191 = vst [vmem:[#allocation4 + $0x28] sm:$0xff] %v1175_v29 }
 0x365   :  { %v1526_v30 = vpop.f32.mrb[16].mxu1 }
 0x366   :  { %v1081_v31 = vpop.f32.mrb[17].mxu1  ;;  %v1180_v33 = vadd.f32 %v1526_v30, %v1315_v14 }
 0x367   :  { %v1527_v32 = vpop.f32.mrb[18].mxu1  ;;  %v1178_v35 = vadd.f32 %v1315_v14, %v1081_v31 }
 0x368   :  { %v1084_v34 = vpop.f32.mrb[19].mxu1  ;;  %1196 = vst [vmem:[#allocation4 + $0x50] sm:$0xff] %v1180_v33  ;;  %v1181_v36 = vadd.f32 %v1527_v32, %v1315_v14 }
 0x369   :  { %1194 = vst [vmem:[#allocation4 + $0x40] sm:$0xff] %v1178_v35  ;;  %v1179_v37 = vadd.f32 %v1315_v14, %v1084_v34 }
 0x36a   :  { %1197 = vst [vmem:[#allocation4 + $0x58] sm:$0xff] %v1181_v36 }
 0x36b   :  { %1195 = vst [vmem:[#allocation4 + $0x48] sm:$0xff] %v1179_v37 }
 0x36d   :  { %v1530_v38 = vpop.f32.mrb[20].mxu1 }
 0x36e   :  { %v1097_v39 = vpop.f32.mrb[21].mxu1  ;;  %v1184_v41 = vadd.f32 %v1530_v38, %v1315_v14 }
 0x36f   :  { %v1531_v40 = vpop.f32.mrb[22].mxu1  ;;  %v1182_v43 = vadd.f32 %v1315_v14, %v1097_v39 }
 0x370   :  { %v1100_v42 = vpop.f32.mrb[23].mxu1  ;;  %1200 = vst [vmem:[#allocation4 + $0x70] sm:$0xff] %v1184_v41  ;;  %v1185_v44 = vadd.f32 %v1531_v40, %v1315_v14 }
 0x371   :  { %1198 = vst [vmem:[#allocation4 + $0x60] sm:$0xff] %v1182_v43  ;;  %v1183_v45 = vadd.f32 %v1315_v14, %v1100_v42 }
 0x372   :  { %1201 = vst [vmem:[#allocation4 + $0x78] sm:$0xff] %v1185_v44 }
 0x373   :  { %1199 = vst [vmem:[#allocation4 + $0x68] sm:$0xff] %v1183_v45 }
 0x374   :  { %1615 = shalt.err (!%p1612_p4)
}
 0x375   :  { %s1616_s16 = scalar_lea.hbm %s2054_s8, 2048 }
 0x376   :  { %p1617_p5 = scmp.ne.s32.totalorder %s2054_s8, %s1616_s16  ;;  %p1620_p6 = scmp.lt.u32.totalorder %s1616_s16, %s2054_s8 }
 0x378   :  { %p1622_p7 = pnand %p1620_p6, %p1617_p5 }
 0x37a   :  { %1625 = shalt.err (!%p1622_p7)
}
 0x37b   :  { %s1631_s21 = smov 128   ;;  %s1632_s22 = smov 8  }
 0x37c   :  { %1213 = dma.vmem_to_hbm [thread:$0]  %s1208_s13, 2048, %s2054_s8, [#allocation5], %s1631_s21, %s1631_s21, %s1632_s22  }
 0x37d   :  { %1626 = dma.done.wait [#allocation5], 2048  }
 0x37e   :  { %1627 = vsyncadd [#allocation5], 4294965248 }
 0x37f   :  { %1217 = vsyncpa [#allocation5], 1 }

</bundles_post_ra>
